<compile_context>
chip_gen: v5e
topology: v5e:2x2
jax: 0.10.0
libtpu: 0.0.40
codegen_flags: <defaults>
</compile_context>

<pallas_src>
import numpy as np
import jax
import jax.numpy as jnp
from jax.experimental import pallas as pl
from jax.experimental.pallas import tpu as pltpu


def discriminator_kernel(xe_ref, xo_ref, w1t_ref, b1_ref, w2at_ref, w2bt_ref,
                         b2_ref, wf1p_ref, bf1_ref, wf2_ref, bf2_ref,
                         o_ref, acc_ref):
    # grid = (batch_tiles, W2); this step handles one (batch tile, w2) pair.
    w2 = pl.program_id(1)

    @pl.when(w2 == 0)
    def _():
        acc_ref[...] = jnp.zeros_like(acc_ref)

    x_e = xe_ref[0]                                               # (TB, H)
    x_o = xo_ref[0]                                               # (TB, H)

    # conv1 (+ ReLU) on the two input columns {8*w2, 8*w2+1}.
    h1_e = jnp.maximum(
        jnp.dot(x_e, w1t_ref[...], preferred_element_type=jnp.float32)
        + b1_ref[...], 0.0)                                       # (TB, 64)
    h1_o = jnp.maximum(
        jnp.dot(x_o, w1t_ref[...], preferred_element_type=jnp.float32)
        + b1_ref[...], 0.0)                                       # (TB, 64)

    # conv2 (+ ReLU): contract input channels for the (k=0, k=1) taps.
    h2 = jnp.maximum(
        jnp.dot(h1_e, w2at_ref[...], preferred_element_type=jnp.float32)
        + jnp.dot(h1_o, w2bt_ref[...], preferred_element_type=jnp.float32)
        + b2_ref[...], 0.0)                                       # (TB, 128)

    # fc1 partial sum: channel-major flatten is folded into the pre-permuted
    # per-w2 weight slab, so no reshape/relayout is needed.
    acc_ref[...] += jnp.dot(h2.astype(jnp.bfloat16), wf1p_ref[0],
                            preferred_element_type=jnp.float32)   # (TB, 1024)

    @pl.when(w2 == pl.num_programs(1) - 1)
    def _():
        h3 = jnp.maximum(acc_ref[...] + bf1_ref[...], 0.0)        # (TB, 1024)
        logit = (jnp.dot(h3, wf2_ref[...], preferred_element_type=jnp.float32)
                 + bf2_ref[...])                                  # (TB, 1)
        o_ref[...] = 1.0 / (1.0 + jnp.exp(-logit))


def discriminator_forward(x, params, tb=None):
    """x: (N, H, W) float32 (== NCHW input with the channel dim squeezed)."""
    N, H, W = x.shape
    w1, b1, w2a, w2b, b2, wf1, bf1, wf2, bf2 = params
    W2 = (W - 2) // 8 + 1
    F = 128 * W2
    assert wf1.shape == (F, 1024)

    # Batch tile: multiple of 8 sublanes, capped at 128 MXU rows.
    if tb is None:
        tb = min(128, max(8, -(-N // 8) * 8))
    n_pad = -(-N // tb) * tb
    if n_pad != N:
        x = jnp.pad(x, ((0, n_pad - N), (0, 0), (0, 0)))

    # Gather only the columns conv2 consumes; put w2 leading, batch in rows.
    idx = 8 * jnp.arange(W2)
    x_e = jnp.transpose(x[:, :, idx], (2, 0, 1))        # (W2, n_pad, H)
    x_o = jnp.transpose(x[:, :, idx + 1], (2, 0, 1))    # (W2, n_pad, H)

    # Conv weights as matmul operands (batch-in-rows orientation).
    w1t = w1.T                                          # (H, 64)
    b1r = b1.reshape(1, 64)
    w2at = w2a.T                                        # (64, 128)
    w2bt = w2b.T                                        # (64, 128)
    b2r = b2.reshape(1, 128)

    # fc1 weight pre-permuted to (W2, 128, 1024) so that
    # wf1p[w2, c, :] == wf1[c*W2 + w2, :]  (channel-major flatten), cast bf16.
    wf1p = wf1.reshape(128, W2, 1024).transpose(1, 0, 2).astype(jnp.bfloat16)

    full = lambda shape: pl.BlockSpec(shape, lambda b, w: tuple(0 for _ in shape))

    out = pl.pallas_call(
        discriminator_kernel,
        out_shape=jax.ShapeDtypeStruct((n_pad, 1), jnp.float32),
        grid_spec=pltpu.PrefetchScalarGridSpec(
            num_scalar_prefetch=0,
            grid=(n_pad // tb, W2),
            in_specs=[
                pl.BlockSpec((1, tb, H), lambda b, w: (w, b, 0)),      # x even cols
                pl.BlockSpec((1, tb, H), lambda b, w: (w, b, 0)),      # x odd cols
                full((H, 64)),                                         # conv1 weight^T
                full((1, 64)),                                         # conv1 bias
                full((64, 128)),                                       # conv2 w (k=0)^T
                full((64, 128)),                                       # conv2 w (k=1)^T
                full((1, 128)),                                        # conv2 bias
                pl.BlockSpec((1, 128, 1024), lambda b, w: (w, 0, 0)),  # fc1 w slab (bf16)
                full((1, 1024)),                                       # fc1 bias
                full((1024, 1)),                                       # fc2 weight
                full((1, 1)),                                          # fc2 bias
            ],
            out_specs=pl.BlockSpec((tb, 1), lambda b, w: (b, 0)),
            scratch_shapes=[pltpu.VMEM((tb, 1024), jnp.float32)],
        ),
        compiler_params=pltpu.CompilerParams(
            dimension_semantics=("parallel", "arbitrary")),
    )(x_e, x_o, w1t, b1r, w2at, w2bt, b2r, wf1p, bf1, wf2, bf2)

    return out[:N]


def reference_forward(x, params):
    """Pure-JAX f32 reference with the exact PyTorch semantics."""
    w1, b1, w2a, w2b, b2, wf1, bf1, wf2, bf2 = params
    N, H, W = x.shape
    W2 = (W - 2) // 8 + 1
    h1 = jax.nn.relu(jnp.einsum('nhw,ch->ncw', x, w1) + b1[None, :, :])   # (N,64,W)
    idx = 8 * jnp.arange(W2)
    h_e, h_o = h1[:, :, idx], h1[:, :, idx + 1]
    h2 = jax.nn.relu(jnp.einsum('ncw,oc->now', h_e, w2a)
                     + jnp.einsum('ncw,oc->now', h_o, w2b)
                     + b2[None, :, :])                                    # (N,128,W2)
    flat = h2.reshape(N, -1)                                              # channel-major
    h3 = jax.nn.relu(flat @ wf1 + bf1)
    return jax.nn.sigmoid(h3 @ wf2 + bf2)


def make_params(key, H, W):
    W2 = (W - 2) // 8 + 1
    F = 128 * W2
    ks = jax.random.split(key, 9)
    s = 0.05
    w1  = s * jax.random.normal(ks[0], (64, H), jnp.float32)    # conv1.weight[:,0,:,0]
    b1  = s * jax.random.normal(ks[1], (64, 1), jnp.float32)
    w2a = s * jax.random.normal(ks[2], (128, 64), jnp.float32)  # conv2.weight[:,:,0,0]
    w2b = s * jax.random.normal(ks[3], (128, 64), jnp.float32)  # conv2.weight[:,:,0,1]
    b2  = s * jax.random.normal(ks[4], (128, 1), jnp.float32)
    wf1 = s * jax.random.normal(ks[5], (F, 1024), jnp.float32)  # fc1.weight.T
    bf1 = s * jax.random.normal(ks[6], (1, 1024), jnp.float32)
    wf2 = s * jax.random.normal(ks[7], (1024, 1), jnp.float32)  # fc2.weight.T
    bf2 = s * jax.random.normal(ks[8], (1, 1), jnp.float32)
    return (w1, b1, w2a, w2b, b2, wf1, bf1, wf2, bf2)


if __name__ == "__main__":
    # Small shapes consistent with the module: num_notes=16, num_tempi=64
    # (reduced from 87/1600; W multiple of 8 so the stride-8 conv2 is exact),
    # batch=2.
    N, H, W = 2, 16, 64
    key = jax.random.PRNGKey(0)
    kx, kp = jax.random.split(key)
    x = jax.random.normal(kx, (N, H, W), jnp.float32)
    params = make_params(kp, H, W)

    out = jax.block_until_ready(discriminator_forward(x, params))
    ref = jax.block_until_ready(reference_forward(x, params))

    assert out.shape == (N, 1)
    # Tolerance relaxed because the fc1 weight/activation path is bf16.
    np.testing.assert_allclose(np.asarray(out), np.asarray(ref),
                               rtol=1e-2, atol=5e-3)
    print("KERNEL_OK")
</pallas_src>

<mosaic_0001>
module attributes {stable_mosaic.version = 11 : i64} {
  func.func @discriminator_kernel(%arg0: i32, %arg1: i32, %arg2: memref<1x8x16xf32, #tpu.memory_space<vmem>>, %arg3: memref<1x8x16xf32, #tpu.memory_space<vmem>>, %arg4: memref<16x64xf32, #tpu.memory_space<vmem>>, %arg5: memref<1x64xf32, #tpu.memory_space<vmem>>, %arg6: memref<64x128xf32, #tpu.memory_space<vmem>>, %arg7: memref<64x128xf32, #tpu.memory_space<vmem>>, %arg8: memref<1x128xf32, #tpu.memory_space<vmem>>, %arg9: memref<1x128x1024xbf16, #tpu.memory_space<vmem>>, %arg10: memref<1x1024xf32, #tpu.memory_space<vmem>>, %arg11: memref<1024x1xf32, #tpu.memory_space<vmem>>, %arg12: memref<1x1xf32, #tpu.memory_space<vmem>>, %arg13: memref<8x1xf32, #tpu.memory_space<vmem>>, %arg14: memref<8x1024xf32, #tpu.memory_space<vmem>>) attributes {dimension_semantics = [#tpu.dimension_semantics<parallel>, #tpu.dimension_semantics<arbitrary>], iteration_bounds = array<i64: 1, 8>, scalar_prefetch = 0 : i64, scratch_operands = 1 : i64, tpu.core_type = #tpu.core_type<tc>, window_params = [{transform_indices = @transform_0, window_bounds = array<i64: 1, 8, 16>}, {transform_indices = @transform_1, window_bounds = array<i64: 1, 8, 16>}, {pipeline_mode = #tpu.pipeline_mode<synchronous>, transform_indices = @transform_2, window_bounds = array<i64: 16, 64>}, {pipeline_mode = #tpu.pipeline_mode<synchronous>, transform_indices = @transform_3, window_bounds = array<i64: 1, 64>}, {pipeline_mode = #tpu.pipeline_mode<synchronous>, transform_indices = @transform_4, window_bounds = array<i64: 64, 128>}, {pipeline_mode = #tpu.pipeline_mode<synchronous>, transform_indices = @transform_5, window_bounds = array<i64: 64, 128>}, {pipeline_mode = #tpu.pipeline_mode<synchronous>, transform_indices = @transform_6, window_bounds = array<i64: 1, 128>}, {transform_indices = @transform_7, window_bounds = array<i64: 1, 128, 1024>}, {pipeline_mode = #tpu.pipeline_mode<synchronous>, transform_indices = @transform_8, window_bounds = array<i64: 1, 1024>}, {pipeline_mode = #tpu.pipeline_mode<synchronous>, transform_indices = @transform_9, window_bounds = array<i64: 1024, 1>}, {pipeline_mode = #tpu.pipeline_mode<synchronous>, transform_indices = @transform_10, window_bounds = array<i64: 1, 1>}, {transform_indices = @transform_11, window_bounds = array<i64: 8, 1>}]} {
    %c0_i32 = arith.constant 0 : i32
    %0 = arith.cmpi eq, %arg1, %c0_i32 : i32
    %1 = arith.extui %0 : i1 to i32
    %c0_i32_0 = arith.constant 0 : i32
    %2 = arith.cmpi ne, %1, %c0_i32_0 : i32
    scf.if %2 {
      %cst_35 = arith.constant 0.000000e+00 : f32
      %41 = vector.broadcast %cst_35 : f32 to vector<8x1024xf32>
      %c0_36 = arith.constant 0 : index
      %c0_37 = arith.constant 0 : index
      %42 = vector.load %arg14[%c0_36, %c0_37] : memref<8x1024xf32, #tpu.memory_space<vmem>>, vector<8x1024xf32>
      tpu.vector_store %arg14[%c0_36, %c0_37], %41 {strides = array<i32>} : memref<8x1024xf32, #tpu.memory_space<vmem>>, vector<8x1024xf32>,
    } else {
    }
    %c0 = arith.constant 0 : index
    %c0_1 = arith.constant 0 : index
    %c0_2 = arith.constant 0 : index
    %3 = vector.load %arg2[%c0, %c0_1, %c0_2] : memref<1x8x16xf32, #tpu.memory_space<vmem>>, vector<1x8x16xf32>
    %4 = vector.shape_cast %3 : vector<1x8x16xf32> to vector<8x16xf32>
    %c0_3 = arith.constant 0 : index
    %c0_4 = arith.constant 0 : index
    %c0_5 = arith.constant 0 : index
    %5 = vector.load %arg3[%c0_3, %c0_4, %c0_5] : memref<1x8x16xf32, #tpu.memory_space<vmem>>, vector<1x8x16xf32>
    %6 = vector.shape_cast %5 : vector<1x8x16xf32> to vector<8x16xf32>
    %c0_6 = arith.constant 0 : index
    %c0_7 = arith.constant 0 : index
    %7 = vector.load %arg4[%c0_6, %c0_7] : memref<16x64xf32, #tpu.memory_space<vmem>>, vector<16x64xf32>
    %cst = arith.constant dense<0.000000e+00> : vector<8x64xf32>
    %8 = tpu.matmul %4, %7, %cst {dimension_numbers = #tpu.dot_dimension_numbers<[1], [0], [0], [1], [0, 0, 1, 1], [], []>} : vector<8x16xf32>, vector<16x64xf32>, vector<8x64xf32> -> vector<8x64xf32>
    %c0_8 = arith.constant 0 : index
    %c0_9 = arith.constant 0 : index
    %9 = vector.load %arg5[%c0_8, %c0_9] : memref<1x64xf32, #tpu.memory_space<vmem>>, vector<1x64xf32>
    %10 = vector.broadcast %9 : vector<1x64xf32> to vector<8x64xf32>
    %11 = arith.addf %8, %10 : vector<8x64xf32>
    %cst_10 = arith.constant 0.000000e+00 : f32
    %12 = vector.broadcast %cst_10 : f32 to vector<8x64xf32>
    %13 = arith.maximumf %11, %12 : vector<8x64xf32>
    %c0_11 = arith.constant 0 : index
    %c0_12 = arith.constant 0 : index
    %14 = vector.load %arg4[%c0_11, %c0_12] : memref<16x64xf32, #tpu.memory_space<vmem>>, vector<16x64xf32>
    %cst_13 = arith.constant dense<0.000000e+00> : vector<8x64xf32>
    %15 = tpu.matmul %6, %14, %cst_13 {dimension_numbers = #tpu.dot_dimension_numbers<[1], [0], [0], [1], [0, 0, 1, 1], [], []>} : vector<8x16xf32>, vector<16x64xf32>, vector<8x64xf32> -> vector<8x64xf32>
    %c0_14 = arith.constant 0 : index
    %c0_15 = arith.constant 0 : index
    %16 = vector.load %arg5[%c0_14, %c0_15] : memref<1x64xf32, #tpu.memory_space<vmem>>, vector<1x64xf32>
    %17 = vector.broadcast %16 : vector<1x64xf32> to vector<8x64xf32>
    %18 = arith.addf %15, %17 : vector<8x64xf32>
    %cst_16 = arith.constant 0.000000e+00 : f32
    %19 = vector.broadcast %cst_16 : f32 to vector<8x64xf32>
    %20 = arith.maximumf %18, %19 : vector<8x64xf32>
    %c0_17 = arith.constant 0 : index
    %c0_18 = arith.constant 0 : index
    %21 = vector.load %arg6[%c0_17, %c0_18] : memref<64x128xf32, #tpu.memory_space<vmem>>, vector<64x128xf32>
    %cst_19 = arith.constant dense<0.000000e+00> : vector<8x128xf32>
    %22 = tpu.matmul %13, %21, %cst_19 {dimension_numbers = #tpu.dot_dimension_numbers<[1], [0], [0], [1], [0, 0, 1, 1], [], []>} : vector<8x64xf32>, vector<64x128xf32>, vector<8x128xf32> -> vector<8x128xf32>
    %c0_20 = arith.constant 0 : index
    %c0_21 = arith.constant 0 : index
    %23 = vector.load %arg7[%c0_20, %c0_21] : memref<64x128xf32, #tpu.memory_space<vmem>>, vector<64x128xf32>
    %cst_22 = arith.constant dense<0.000000e+00> : vector<8x128xf32>
    %24 = tpu.matmul %20, %23, %cst_22 {dimension_numbers = #tpu.dot_dimension_numbers<[1], [0], [0], [1], [0, 0, 1, 1], [], []>} : vector<8x64xf32>, vector<64x128xf32>, vector<8x128xf32> -> vector<8x128xf32>
    %25 = arith.addf %22, %24 : vector<8x128xf32>
    %c0_23 = arith.constant 0 : index
    %c0_24 = arith.constant 0 : index
    %26 = vector.load %arg8[%c0_23, %c0_24] : memref<1x128xf32, #tpu.memory_space<vmem>>, vector<1x128xf32>
    %27 = vector.broadcast %26 : vector<1x128xf32> to vector<8x128xf32>
    %28 = arith.addf %25, %27 : vector<8x128xf32>
    %cst_25 = arith.constant 0.000000e+00 : f32
    %29 = vector.broadcast %cst_25 : f32 to vector<8x128xf32>
    %30 = arith.maximumf %28, %29 : vector<8x128xf32>
    %c0_26 = arith.constant 0 : index
    %c0_27 = arith.constant 0 : index
    %31 = vector.load %arg14[%c0_26, %c0_27] : memref<8x1024xf32, #tpu.memory_space<vmem>>, vector<8x1024xf32>
    %32 = arith.truncf %30 : vector<8x128xf32> to vector<8x128xbf16>
    %c0_28 = arith.constant 0 : index
    %c0_29 = arith.constant 0 : index
    %c0_30 = arith.constant 0 : index
    %33 = vector.load %arg9[%c0_28, %c0_29, %c0_30] : memref<1x128x1024xbf16, #tpu.memory_space<vmem>>, vector<1x128x1024xbf16>
    %34 = vector.shape_cast %33 : vector<1x128x1024xbf16> to vector<128x1024xbf16>
    %cst_31 = arith.constant dense<0.000000e+00> : vector<8x1024xf32>
    %35 = tpu.matmul %32, %34, %cst_31 {dimension_numbers = #tpu.dot_dimension_numbers<[1], [0], [0], [1], [0, 0, 1, 1], [], []>} : vector<8x128xbf16>, vector<128x1024xbf16>, vector<8x1024xf32> -> vector<8x1024xf32>
    %36 = arith.addf %31, %35 : vector<8x1024xf32>
    %c0_32 = arith.constant 0 : index
    %c0_33 = arith.constant 0 : index
    %37 = vector.load %arg14[%c0_32, %c0_33] : memref<8x1024xf32, #tpu.memory_space<vmem>>, vector<8x1024xf32>
    tpu.vector_store %arg14[%c0_32, %c0_33], %36 {strides = array<i32>} : memref<8x1024xf32, #tpu.memory_space<vmem>>, vector<8x1024xf32>,
    %c7_i32 = arith.constant 7 : i32
    %38 = arith.cmpi eq, %arg1, %c7_i32 : i32
    %39 = arith.extui %38 : i1 to i32
    %c0_i32_34 = arith.constant 0 : i32
    %40 = arith.cmpi ne, %39, %c0_i32_34 : i32
    scf.if %40 {
      %c0_35 = arith.constant 0 : index
      %c0_36 = arith.constant 0 : index
      %41 = vector.load %arg14[%c0_35, %c0_36] : memref<8x1024xf32, #tpu.memory_space<vmem>>, vector<8x1024xf32>
      %c0_37 = arith.constant 0 : index
      %c0_38 = arith.constant 0 : index
      %42 = vector.load %arg10[%c0_37, %c0_38] : memref<1x1024xf32, #tpu.memory_space<vmem>>, vector<1x1024xf32>
      %43 = vector.broadcast %42 : vector<1x1024xf32> to vector<8x1024xf32>
      %44 = arith.addf %41, %43 : vector<8x1024xf32>
      %cst_39 = arith.constant 0.000000e+00 : f32
      %45 = vector.broadcast %cst_39 : f32 to vector<8x1024xf32>
      %46 = arith.maximumf %44, %45 : vector<8x1024xf32>
      %c0_40 = arith.constant 0 : index
      %c0_41 = arith.constant 0 : index
      %47 = vector.load %arg11[%c0_40, %c0_41] : memref<1024x1xf32, #tpu.memory_space<vmem>>, vector<1024x1xf32>
      %cst_42 = arith.constant dense<0.000000e+00> : vector<8x1xf32>
      %48 = tpu.matmul %46, %47, %cst_42 {dimension_numbers = #tpu.dot_dimension_numbers<[1], [0], [0], [1], [0, 0, 1, 1], [], []>} : vector<8x1024xf32>, vector<1024x1xf32>, vector<8x1xf32> -> vector<8x1xf32>
      %c0_43 = arith.constant 0 : index
      %c0_44 = arith.constant 0 : index
      %49 = vector.load %arg12[%c0_43, %c0_44] : memref<1x1xf32, #tpu.memory_space<vmem>>, vector<1x1xf32>
      %50 = vector.broadcast %49 : vector<1x1xf32> to vector<8x1xf32>
      %51 = arith.addf %48, %50 : vector<8x1xf32>
      %cst_45 = arith.constant 0.000000e+00 : f32
      %52 = vector.broadcast %cst_45 : f32 to vector<8x1xf32>
      %53 = arith.subf %52, %51 : vector<8x1xf32>
      %54 = math.exp %53 : vector<8x1xf32>
      %cst_46 = arith.constant 1.000000e+00 : f32
      %55 = vector.broadcast %cst_46 : f32 to vector<8x1xf32>
      %56 = arith.addf %55, %54 : vector<8x1xf32>
      %cst_47 = arith.constant 1.000000e+00 : f32
      %57 = vector.broadcast %cst_47 : f32 to vector<8x1xf32>
      %58 = arith.divf %57, %56 : vector<8x1xf32>
      %c0_48 = arith.constant 0 : index
      %c0_49 = arith.constant 0 : index
      %59 = vector.load %arg13[%c0_48, %c0_49] : memref<8x1xf32, #tpu.memory_space<vmem>>, vector<8x1xf32>
      tpu.vector_store %arg13[%c0_48, %c0_49], %58 {strides = array<i32>} : memref<8x1xf32, #tpu.memory_space<vmem>>, vector<8x1xf32>,
    } else {
    }
    return
  }
  func.func @transform_0(%arg0: i32, %arg1: i32) -> (i32, i32, i32) {
    %c0_i32 = arith.constant 0 : i32
    %c0_i32_0 = arith.constant 0 : i32
    return %arg1, %arg0, %c0_i32 : i32, i32, i32
  }
  func.func @transform_1(%arg0: i32, %arg1: i32) -> (i32, i32, i32) {
    %c0_i32 = arith.constant 0 : i32
    %c0_i32_0 = arith.constant 0 : i32
    return %arg1, %arg0, %c0_i32 : i32, i32, i32
  }
  func.func @transform_2(%arg0: i32, %arg1: i32) -> (i32, i32) {
    %c0_i32 = arith.constant 0 : i32
    %c0_i32_0 = arith.constant 0 : i32
    %c0_i32_1 = arith.constant 0 : i32
    return %c0_i32, %c0_i32_0 : i32, i32
  }
  func.func @transform_3(%arg0: i32, %arg1: i32) -> (i32, i32) {
    %c0_i32 = arith.constant 0 : i32
    %c0_i32_0 = arith.constant 0 : i32
    %c0_i32_1 = arith.constant 0 : i32
    return %c0_i32, %c0_i32_0 : i32, i32
  }
  func.func @transform_4(%arg0: i32, %arg1: i32) -> (i32, i32) {
    %c0_i32 = arith.constant 0 : i32
    %c0_i32_0 = arith.constant 0 : i32
    %c0_i32_1 = arith.constant 0 : i32
    return %c0_i32, %c0_i32_0 : i32, i32
  }
  func.func @transform_5(%arg0: i32, %arg1: i32) -> (i32, i32) {
    %c0_i32 = arith.constant 0 : i32
    %c0_i32_0 = arith.constant 0 : i32
    %c0_i32_1 = arith.constant 0 : i32
    return %c0_i32, %c0_i32_0 : i32, i32
  }
  func.func @transform_6(%arg0: i32, %arg1: i32) -> (i32, i32) {
    %c0_i32 = arith.constant 0 : i32
    %c0_i32_0 = arith.constant 0 : i32
    %c0_i32_1 = arith.constant 0 : i32
    return %c0_i32, %c0_i32_0 : i32, i32
  }
  func.func @transform_7(%arg0: i32, %arg1: i32) -> (i32, i32, i32) {
    %c0_i32 = arith.constant 0 : i32
    %c0_i32_0 = arith.constant 0 : i32
    %c0_i32_1 = arith.constant 0 : i32
    return %arg1, %c0_i32, %c0_i32_0 : i32, i32, i32
  }
  func.func @transform_8(%arg0: i32, %arg1: i32) -> (i32, i32) {
    %c0_i32 = arith.constant 0 : i32
    %c0_i32_0 = arith.constant 0 : i32
    %c0_i32_1 = arith.constant 0 : i32
    return %c0_i32, %c0_i32_0 : i32, i32
  }
  func.func @transform_9(%arg0: i32, %arg1: i32) -> (i32, i32) {
    %c0_i32 = arith.constant 0 : i32
    %c0_i32_0 = arith.constant 0 : i32
    %c0_i32_1 = arith.constant 0 : i32
    return %c0_i32, %c0_i32_0 : i32, i32
  }
  func.func @transform_10(%arg0: i32, %arg1: i32) -> (i32, i32) {
    %c0_i32 = arith.constant 0 : i32
    %c0_i32_0 = arith.constant 0 : i32
    %c0_i32_1 = arith.constant 0 : i32
    return %c0_i32, %c0_i32_0 : i32, i32
  }
  func.func @transform_11(%arg0: i32, %arg1: i32) -> (i32, i32) {
    %c0_i32 = arith.constant 0 : i32
    %c0_i32_0 = arith.constant 0 : i32
    return %arg0, %c0_i32 : i32, i32
  }
}

</mosaic_0001>

<bundles_post_ra>
// kernel: tpu_custom_call.1
= control target key start
LH: loop header
LB: loop body
LE: loop exit
PB: predicated region body
PF: predicated region fallthrough
CT: control target
= control target key end

     0   :  { %s3414_s0 = inlined_call_operand.hbm [shape: f32[8,8,16], index: 0, kind: input, shape index: {}]   ;;  %s3415_s1 = inlined_call_operand.hbm [shape: f32[8,8,16], index: 1, kind: input, shape index: {}]   ;;  %s3416_s2 = inlined_call_operand.hbm [shape: f32[16,64], index: 2, kind: input, shape index: {}]   ;;  %s3417_s3 = inlined_call_operand.hbm [shape: f32[1,64], index: 3, kind: input, shape index: {}]   ;;  %s3418_s4 = inlined_call_operand.hbm [shape: f32[64,128], index: 4, kind: input, shape index: {}]   ;;  %s3419_s5 = inlined_call_operand.hbm [shape: f32[64,128], index: 5, kind: input, shape index: {}]   ;;  %s3420_s6 = inlined_call_operand.hbm [shape: f32[1,128], index: 6, kind: input, shape index: {}]   ;;  %s3421_s7 = inlined_call_operand.hbm [shape: bf16[8,128,1024], index: 7, kind: input, shape index: {}]   ;;  %s3422_s8 = inlined_call_operand.hbm [shape: f32[1,1024], index: 8, kind: input, shape index: {}]   ;;  %s3423_s9 = inlined_call_operand.vmem [shape: f32[1024,1], index: 9, kind: input, shape index: {}]   ;;  %s3424_s10 = inlined_call_operand.<no memory space> [shape: f32[1,1], index: 10, kind: input, shape index: {}]   ;;  %s3425_s11 = inlined_call_operand.vmem [shape: f32[8,1], index: 11, kind: output, shape index: {}]  }
   0x1   :  { %3428 = sst [smem:[#allocation25_spill]] %s3414_s0  ;;  %v16_v0 = vstv %s3424_s10 }
   0x2   :  { %3429 = sst [smem:[#allocation26_spill]] %s3415_s1  ;;  %17 = vst [vmem:[#allocation3] sm:$0x1] %v16_v0 }
   0x3   :  { %3430 = sst [smem:[#allocation27_spill]] %s3416_s2 }
   0x4   :  { %3431 = sst [smem:[#allocation28_spill]] %s3417_s3 }
   0x5   :  { %3432 = sst [smem:[#allocation29_spill]] %s3418_s4 }
   0x6   :  { %3433 = sst [smem:[#allocation30_spill]] %s3419_s5 }
   0x7   :  { %3434 = sst [smem:[#allocation31_spill]] %s3420_s6 }
   0x8   :  { %3435 = sst [smem:[#allocation32_spill]] %s3423_s9 }
   0x9   :  { %3436 = sst [smem:[#allocation33_spill]] %s3425_s11 }
   0xa   :  { %18 = vsyncpa [#allocation5], 0 }
   0xb   :  { %20 = vsyncpa [#allocation5 + $0x1], 0 }
   0xc   :  { %21 = vsyncpa [#allocation7], 0 }
   0xd   :  { %23 = vsyncpa [#allocation7 + $0x1], 0 }
   0xe   :  { %24 = vsyncpa [#allocation10], 0 }
   0xf   :  { %25 = vsyncpa [#allocation13], 0 }
  0x10   :  { %26 = vsyncpa [#allocation16], 0 }
  0x11   :  { %28 = vsyncpa [#allocation16 + $0x1], 0  ;;  %s2695_s19 = smov 0   ;;  %s2697_s20 = smov 0  }
  0x12   :  { %s2699_s21 = smov 0   ;;  %s2701_s22 = smov 0  }
  0x13   :  { %s2703_s23 = smov 0   ;;  %s2705_s10 = smov 0  }
  0x14 LB: > { %s3426_s24 = sadd.s32 4294967295, %s2619_s10   ;;  %p1782_p0 = scmp.ge.s32.totalorder %s2619_s10, 1  ;;  %s2619_s10 = sphi %s2705_s10, %s34_s10   ;;  %s2615_s23 = sphi %s2703_s23, %s3458_s23   ;;  %s2611_s22 = sphi %s2701_s22, %s3457_s22   ;;  %s2607_s21 = sphi %s2699_s21, %s3456_s21   ;;  %s2603_s20 = sphi %s2697_s20, %s3455_s20   ;;  %s2599_s19 = sphi %s2695_s19, %s3454_s19  }
  0x15   : > { %p2729_p1 = scmp.eq.s32.totalorder %s3426_s24, 0  ;;  %p327_p2 = scmp.lt.s32.totalorder %s2619_s10, 9 }
  0x16   : > { %s3438_s2 = sld [smem:[#allocation27_spill]]  ;;  %s2621_s30 = smov [#allocation8]  }
  0x17   : > { %p2737_p3 = pnand %p1782_p0, %p327_p2  ;;  %s340_s12 = sshll.u32 %s2621_s30, 4  ;;  %s341_s12 = int_to_ptr.vmem [resolvable:$true] %s340_s12 }
  0x18   : > { %s3441_s3 = sld [smem:[#allocation28_spill]]  ;;  %s2622_s17 = smov 128  }
  0x19   : > { %p2167_p4 = pneg %p2737_p3  ;;  %s2623_s18 = smov 8  }
  0x1a   : > { %s2624_s26 = smov [#allocation9]   ;;  %s3442_s5 = sld [smem:[#allocation30_spill]] }
  0x1b   : > { %p2745_p5 = pnand %p2167_p4, %p2729_p1  ;;  %s355_s27 = sshll.u32 %s2624_s26, 4  ;;  %s356_s27 = int_to_ptr.vmem [resolvable:$true] %s355_s27 }
  0x1c   : > { %s338_s28 = sshll.u32 %s3438_s2, 4  ;;  %s2625_s11 = smov [#allocation12]   ;;  %s339_s28 = int_to_ptr.hbm [resolvable:$true] %s338_s28 }
  0x1d   : > { %2170 = dma.hbm_to_vmem [thread:$0]  (!%p2745_p5), %s339_s28, 256, %s341_s12, [#allocation7], %s2622_s17, %s2622_s17, %s2623_s18  }
  0x1e   : > { %s353_s16 = sshll.u32 %s3441_s3, 4  ;;  %s405_s3 = sshll.u32 %s3422_s8, 4  ;;  %s354_s16 = int_to_ptr.hbm [resolvable:$true] %s353_s16  ;;  %s406_s3 = int_to_ptr.hbm [resolvable:$true] %s405_s3 }
  0x1f   : > { %2173 = dma.hbm_to_vmem [thread:$0]  (!%p2745_p5), %s354_s16, 16, %s356_s27, [#allocation10]  }
  0x20   : > { %s378_s2 = sshll.u32 %s3442_s5, 4  ;;  %s380_s9 = sshll.u32 %s2625_s11, 4  ;;  %s379_s2 = int_to_ptr.hbm [resolvable:$true] %s378_s2  ;;  %s381_s9 = int_to_ptr.vmem [resolvable:$true] %s380_s9 }
  0x21   : > { %2179 = dma.hbm_to_vmem [thread:$0]  (!%p2745_p5), %s379_s2, 1024, %s381_s9, [#allocation13], %s2622_s17, %s2622_s17, %s2623_s18  }
  0x22   : > { %s2626_s28 = smov [#allocation17]   ;;  %s3443_s4 = sld [smem:[#allocation29_spill]] }
  0x23   : > { %s407_s24 = sshll.u32 %s2626_s28, 4  ;;  %s3444_s6 = sld [smem:[#allocation31_spill]]  ;;  %s408_s24 = int_to_ptr.vmem [resolvable:$true] %s407_s24 }
  0x24   : > { %2185 = dma.hbm_to_vmem [thread:$0]  (!%p2745_p5), %s406_s3, 128, %s408_s24, [#allocation16]  }
  0x25   : > { %s2627_s9 = smov [#allocation11]   ;;  %s2628_s14 = smov [#allocation14]  }
  0x26   : > { %s366_s30 = sshll.u32 %s2627_s9, 4  ;;  %s395_s15 = sshll.u32 %s2628_s14, 4  ;;  %s367_s30 = int_to_ptr.vmem [resolvable:$true] %s366_s30  ;;  %s396_s15 = int_to_ptr.vmem [resolvable:$true] %s395_s15 }
  0x27   : > { %s43_s3 = sadd.s32 1, %s2615_s23  ;;  %s55_s28 = sadd.s32 1, %s2607_s21 }
  0x28   : > { %s364_s16 = sshll.u32 %s3443_s4, 4  ;;  %p44_p6 = scmp.ge.s32.totalorder %s43_s3, 8  ;;  %s365_s16 = int_to_ptr.hbm [resolvable:$true] %s364_s16 }
  0x29   : > { %s393_s2 = sshll.u32 %s3444_s6, 4  ;;  %p62_p7 = scmp.ne.s32.totalorder %s2607_s21, %s2603_s20  ;;  %s394_s2 = int_to_ptr.hbm [resolvable:$true] %s393_s2 }
  0x2a   : > { %2176 = dma.hbm_to_vmem [thread:$0]  (!%p2745_p5), %s365_s16, 1024, %s367_s30, [#allocation10], %s2622_s17, %s2622_s17, %s2623_s18  }
  0x2b   : > { %2182 = dma.hbm_to_vmem [thread:$0]  (!%p2745_p5), %s394_s2, 16, %s396_s15, [#allocation13]  }
  0x2c   : > { %p63_p8 = scmp.eq.s32.totalorder %s2619_s10, 0  ;;  %p68_p9 = scmp.ne.s32.totalorder %s2603_s20, %s2599_s19 }
  0x2d   : > { %s3460_s3 = smov (%p44_p6, %s43_s3), 0  ;;  %p2202_p12 = scmp.lt.s32.totalorder %s2619_s10, 8 }
  0x2e   : > { %p2785_p10 = por %p63_p8, %p62_p7  ;;  %p2791_p11 = por %p2729_p1, %p68_p9 }
  0x2f   : > { %s50_s17 = ssub.s32 %s2615_s23, %s3460_s3  ;;  %s424_s18 = sand.u32 1, %s2607_s21  }
  0x30   : > { %p53_p13 = scmp.eq.s32.totalorder %s50_s17, 0  ;;  %s1790_s12 = sshll.u32 %s424_s18, 3 }
  0x31   : > { %s1791_s26 = sshll.u32 %s2615_s23, 3  ;;  %s3447_s0 = sld [smem:[#allocation25_spill]] }
  0x32   : > { %s2800_s19 = scalar_select %p53_p13, %s2607_s21, %s55_s28  }
  0x33   : > { %s428_s2 = scalar_lea.vmem [#allocation4], %s1790_s12  ;;  %p2808_p0 = pnand %p2202_p12, %p2785_p10 }
  0x34   : > { %s437_s9 = sshll.u32 %s428_s2, 4  ;;  %s3449_s1 = sld [smem:[#allocation26_spill]]  ;;  %s438_s9 = int_to_ptr.vmem [resolvable:$true] %s437_s9 }
  0x35   : > { %s1794_s4 = sshll.u32 %s424_s18, 9  ;;  %s425_s16 = scalar_lea.sflag [#allocation5], %s424_s18 }
  0x36   : > { %s444_s11 = sand.u32 1, %s2619_s10   ;;  %s2072_s15 = sshll.u32 %s2615_s23, 9 }
  0x37   : > { %s433_s27 = scalar_lea.hbm %s3447_s0, %s1791_s26  ;;  %s448_s0 = scalar_lea.vmem [#allocation6], %s1790_s12 }
  0x38   : > { %s435_s30 = sshll.u32 %s433_s27, 4  ;;  %s468_s27 = scalar_lea.vmem [#allocation15], %s1794_s4  ;;  %s436_s30 = int_to_ptr.hbm [resolvable:$true] %s435_s30 }
  0x39   : > { %2189 = dma.hbm_to_vmem [thread:$0]  (!%p2808_p0), %s436_s30, 128, %s438_s9, %s425_s16  }
  0x3a   : > { %s453_s28 = scalar_lea.hbm %s3449_s1, %s1791_s26  ;;  %s476_s2 = sshll.u32 %s468_s27, 4  ;;  %s477_s2 = int_to_ptr.vmem [resolvable:$true] %s476_s2 }
  0x3b   : > { %s455_s24 = sshll.u32 %s453_s28, 4  ;;  %s457_s5 = sshll.u32 %s448_s0, 4  ;;  %s456_s24 = int_to_ptr.hbm [resolvable:$true] %s455_s24  ;;  %s458_s5 = int_to_ptr.vmem [resolvable:$true] %s457_s5 }
  0x3c   : > { %s445_s6 = scalar_lea.sflag [#allocation7], %s444_s11  ;;  %s473_s18 = scalar_lea.hbm %s3421_s7, %s2072_s15 }
  0x3d   : > { %2192 = dma.hbm_to_vmem [thread:$0]  (!%p2808_p0), %s456_s24, 128, %s458_s5, %s445_s6  }
  0x3e   : > { %s474_s1 = sshll.u32 %s473_s18, 4  ;;  %s465_s9 = scalar_lea.sflag [#allocation16], %s444_s11  ;;  %s475_s1 = int_to_ptr.hbm [resolvable:$true] %s474_s1 }
  0x3f   : > { %s2629_s4 = smov 512   ;;  %s2630_s30 = smov 32  }
  0x40   : > { %2195 = dma.hbm_to_vmem [thread:$0]  (!%p2808_p0), %s475_s1, 8192, %s477_s2, %s465_s9, %s2629_s4, %s2629_s4, %s2630_s30  }
  0x41   : > { %488 = sbr.rel (%p2737_p3) target bundleno = 767 (0x2ff), region = 64  ;;  %s490_s0 = sand.u32 (!%p2737_p3), 1, %s2603_s20  }
  0x42   : > { %s1798_s12 = sshll.u32 (!%p2737_p3), %s490_s0, 3  ;;  %s491_s5 = scalar_lea.sflag (!%p2737_p3), [#allocation5], %s490_s0 }
  0x43   : > { %s2829_s6 = scalar_lea.vmem (!%p2737_p3), [#allocation4], %s1798_s12 }
  0x46   : > { %2570 = dma.done.wait (%p2791_p11), %s491_s5, 128  }
  0x47   : > { %2572 = vsyncadd (%p2791_p11), %s491_s5, 4294967168  ;;  %s3450_s28 = sadd.s32 4294967295, %s2619_s10   ;;  %s2837_s16 = scalar_lea.vmem [#allocation6], %s1798_s12 }
  0x48   : > { %s500_s14 = sand.u32 1, %s3450_s28  }
  0x49   : > { %s501_s1 = scalar_lea.sflag [#allocation7], %s500_s14 }
  0x4a   : > { %2574 = dma.done.wait (%p2791_p11), %s501_s1, 128  }
  0x4b   : > { %2576 = vsyncadd (%p2791_p11), %s501_s1, 4294967168 }
  0x4c   : > { %2578 = dma.done.wait (%p2729_p1), [#allocation7], 256  }
  0x4d   : > { %2580 = vsyncadd (%p2729_p1), [#allocation7], 4294967040 }
  0x4e   : > { %2582 = dma.done.wait (%p2729_p1), [#allocation10], 1040  }
  0x4f   : > { %2584 = vsyncadd (%p2729_p1), [#allocation10], 4294966256 }
  0x50   : > { %2586 = dma.done.wait (%p2729_p1), [#allocation13], 1040  }
  0x51   : > { %2588 = vsyncadd (%p2729_p1), [#allocation13], 4294966256  ;;  %s1805_s29 = sshll.u32 %s490_s0, 9  ;;  %s536_s11 = scalar_lea.sflag [#allocation16], %s500_s14 }
  0x52   : > { %s2855_s27 = scalar_lea.vmem [#allocation15], %s1805_s29 }
  0x53   : > { %2590 = dma.done.wait (%p2791_p11), %s536_s11, 8192  }
  0x54   : > { %2592 = vsyncadd (%p2791_p11), %s536_s11, 4294959104 }
  0x55   : > { %2594 = dma.done.wait (%p2729_p1), [#allocation16], 128  }
  0x56   : > { %2596 = vsyncadd (%p2729_p1), [#allocation16], 4294967168  ;;  %p1807_p2 = scmp.ne.s32.totalorder %s2611_s22, 0 }
  0x58   : > { %600 = sbr.rel (%p1807_p2) target bundleno = 102 (0x66), region = 104 }
  0x5d   : > { %v2631_v1 = vmov 0.0  }
  0x5e   : > { %601 = vst [vmem:[#allocation2 + $0x30] sm:$0xff] %v2631_v1 }
  0x5f   : > { %602 = vst [vmem:[#allocation2] sm:$0xff] %v2631_v1 }
  0x60   : > { %603 = vst [vmem:[#allocation2 + $0x18] sm:$0xff] %v2631_v1 }
  0x61   : > { %604 = vst [vmem:[#allocation2 + $0x10] sm:$0xff] %v2631_v1 }
  0x62   : > { %605 = vst [vmem:[#allocation2 + $0x8] sm:$0xff] %v2631_v1 }
  0x63   : > { %606 = vst [vmem:[#allocation2 + $0x20] sm:$0xff] %v2631_v1 }
  0x64   : > { %607 = vst [vmem:[#allocation2 + $0x28] sm:$0xff] %v2631_v1 }
  0x65   : > { %608 = vst [vmem:[#allocation2 + $0x38] sm:$0xff] %v2631_v1 }
  0x66 PF: > { %v612_v2 = vld [vmem:[#allocation8 + $0x8] sm:$0xff]  ;;  %v611_v3 = vld [vmem:[#allocation8] sm:$0xff]  ;;  %vm617_vm0 = vcmask 130048   ;;  %v610_v5 = vld [vmem:[%s2837_s16] sm:$0xff]  ;;  %vm682_vm1 = vcmask 523264   ;;  %p2068_p1 = scmp.ne.s32.totalorder %s2611_s22, 7 }
  0x67   : > { %v609_v4 = vld [vmem:[%s2829_s6] sm:$0xff]  ;;  %635 = vmatpush.msra.mxu0 %v612_v2  ;;  %659 = vmatpush.msra.mxu1 %v612_v2  ;;  %v678_v12 = vld [vmem:[#allocation12 + $0x20] sm:$0xff]  ;;  %v2046_v27 = vld [vmem:[%s2855_s27 + $0x1c8] sm:$0xf]  ;;  %s3451_s2 = sld [smem:[#allocation32_spill]] (!%p2068_p1) }
  0x68   : > { %v681_v6 = vld [vmem:[#allocation12 + $0x38] sm:$0xff]  ;;  %v680_v8 = vld [vmem:[#allocation12 + $0x30] sm:$0xff]  ;;  %v679_v10 = vld [vmem:[#allocation12 + $0x28] sm:$0xff]  ;;  %s3452_s14 = sld [smem:[#allocation33_spill]] (!%p2068_p1) }
  0x69   : > { %v673_v7 = vld [vmem:[#allocation11 + $0x38] sm:$0xff]  ;;  %694 = vmatpush.msra.mxu2 %v681_v6  ;;  %v672_v9 = vld [vmem:[#allocation11 + $0x30] sm:$0xff]  ;;  %636 = vmatpush.msra.mxu0 %v611_v3  ;;  %v671_v11 = vld [vmem:[#allocation11 + $0x28] sm:$0xff] }
  0x6a   : > { %717 = vmatpush.msra.mxu3 %v673_v7  ;;  %660 = vmatpush.msra.mxu1 %v611_v3  ;;  %v670_v13 = vld [vmem:[#allocation11 + $0x20] sm:$0xff]  ;;  %v677_v14 = vld [vmem:[#allocation12 + $0x18] sm:$0xff]  ;;  %v676_v16 = vld [vmem:[#allocation12 + $0x10] sm:$0xff] }
  0x6b   : > { %1808 = vmatmul.msk.f32.vlgmr.msra.gmra.mxu0 %vm617_vm0, %v609_v4  ;;  %1809 = vmatmul.msk.f32.vlgmr.msra.gmra.mxu1 %vm617_vm0, %v610_v5  ;;  %v669_v15 = vld [vmem:[#allocation11 + $0x18] sm:$0xff]  ;;  %v668_v17 = vld [vmem:[#allocation11 + $0x10] sm:$0xff]  ;;  %v675_v18 = vld [vmem:[#allocation12 + $0x8] sm:$0xff] }
  0x6c   : > { %695 = vmatpush.msra.mxu2 %v680_v8  ;;  %718 = vmatpush.msra.mxu3 %v672_v9  ;;  %v667_v19 = vld [vmem:[#allocation11 + $0x8] sm:$0xff]  ;;  %v674_v20 = vld [vmem:[#allocation12] sm:$0xff] }
  0x6d   : > { %v666_v21 = vld [vmem:[#allocation11] sm:$0xff]  ;;  %v2134_v28 = vld [vmem:[%s2855_s27 + $0x1e4] sm:$0xf0]  ;;  %v2130_v31 = vld [vmem:[%s2855_s27 + $0x1cc] sm:$0xf] }
  0x6e   : > { %696 = vmatpush.msra.mxu2 %v679_v10  ;;  %719 = vmatpush.msra.mxu3 %v671_v11  ;;  %v2038_v22 = vld [vmem:[%s2855_s27 + $0x1c0] sm:$0xf]  ;;  %v2129_v24 = vld [vmem:[%s2855_s27 + $0x1c4] sm:$0xf]  ;;  %v2047_v30 = vor.u32 %v2134_v28, %v2046_v27  ;;  %v2048_v32 = vld [vmem:[%s2855_s27 + $0x1e8] sm:$0xf0] }
  0x6f   : > { %v2133_v23 = vld [vmem:[%s2855_s27 + $0x1dc] sm:$0xf0]  ;;  %v2040_v26 = vld [vmem:[%s2855_s27 + $0x1e0] sm:$0xf0]  ;;  %v2051_v34 = vor.u32 %v2130_v31, %v2048_v32  ;;  %v2014_v40 = vld [vmem:[%s2855_s27 + $0x188] sm:$0xf] }
  0x70   : > { %697 = vmatpush.msra.mxu2 %v678_v12  ;;  %720 = vmatpush.msra.mxu3 %v670_v13  ;;  %v2039_v25 = vor.u32 %v2133_v23, %v2038_v22  ;;  %v2043_v29 = vor.u32 %v2129_v24, %v2040_v26  ;;  %v2006_v33 = vld [vmem:[%s2855_s27 + $0x180] sm:$0xf]  ;;  %v2121_v36 = vld [vmem:[%s2855_s27 + $0x184] sm:$0xf]  ;;  %v2126_v41 = vld [vmem:[%s2855_s27 + $0x1a4] sm:$0xf0] }
  0x71   : > { %v2125_v35 = vld [vmem:[%s2855_s27 + $0x19c] sm:$0xf0]  ;;  %v2008_v37 = vld [vmem:[%s2855_s27 + $0x1a0] sm:$0xf0]  ;;  %v2122_v42 = vld [vmem:[%s2855_s27 + $0x18c] sm:$0xf]  ;;  %v2015_v43 = vor.u32 %v2126_v41, %v2014_v40 }
  0x72   : > { %698 = vmatpush.msra.mxu2 %v677_v14  ;;  %721 = vmatpush.msra.mxu3 %v669_v15  ;;  %v2007_v38 = vor.u32 %v2125_v35, %v2006_v33  ;;  %v2011_v39 = vor.u32 %v2121_v36, %v2008_v37  ;;  %v2016_v44 = vld [vmem:[%s2855_s27 + $0x1a8] sm:$0xf0]  ;;  %v1974_v45 = vld [vmem:[%s2855_s27 + $0x140] sm:$0xf]  ;;  %v2113_v48 = vld [vmem:[%s2855_s27 + $0x144] sm:$0xf] }
  0x73   : > { %1128 = vmatpush.bf16.msrb.mxu0 %v2039_v25  ;;  %1141 = vmatpush.bf16.msrb.mxu1 %v2043_v29  ;;  %v2117_v46 = vld [vmem:[%s2855_s27 + $0x15c] sm:$0xf0]  ;;  %v2019_v47 = vor.u32 %v2122_v42, %v2016_v44  ;;  %v1976_v49 = vld [vmem:[%s2855_s27 + $0x160] sm:$0xf0]  ;;  %v1982_v50 = vld [vmem:[%s2855_s27 + $0x148] sm:$0xf] }
  0x74   : > { %699 = vmatpush.msra.mxu2 %v676_v16  ;;  %722 = vmatpush.msra.mxu3 %v668_v17  ;;  %v1975_v51 = vor.u32 %v2117_v46, %v1974_v45  ;;  %v2118_v52 = vld [vmem:[%s2855_s27 + $0x164] sm:$0xf0]  ;;  %v2114_v53 = vld [vmem:[%s2855_s27 + $0x14c] sm:$0xf]  ;;  %v1979_v55 = vor.u32 %v2113_v48, %v1976_v49  ;;  %v1942_v57 = vld [vmem:[%s2855_s27 + $0x100] sm:$0xf] }
  0x75   : > { %v1984_v54 = vld [vmem:[%s2855_s27 + $0x168] sm:$0xf0]  ;;  %v1983_v56 = vor.u32 %v2118_v52, %v1982_v50  ;;  %v2109_v58 = vld [vmem:[%s2855_s27 + $0x11c] sm:$0xf0]  ;;  %v2105_v59 = vld [vmem:[%s2855_s27 + $0x104] sm:$0xf] }
  0x76   : > { %700 = vmatpush.msra.mxu2 %v675_v18  ;;  %723 = vmatpush.msra.mxu3 %v667_v19  ;;  %v1987_v60 = vor.u32 %v2114_v53, %v1984_v54  ;;  %v1944_v61 = vld [vmem:[%s2855_s27 + $0x120] sm:$0xf0]  ;;  %v1950_v62 = vld [vmem:[%s2855_s27 + $0x108] sm:$0xf]  ;;  %v2106_v0 = vld [vmem:[%s2855_s27 + $0x10c] sm:$0xf]  ;;  %v1943_v2 = vor.u32 %v2109_v58, %v1942_v57 }
  0x77   : > { %1129 = vmatpush.bf16.msrb.mxu0 %v2007_v38  ;;  %1142 = vmatpush.bf16.msrb.mxu1 %v2011_v39  ;;  %v2110_v63 = vld [vmem:[%s2855_s27 + $0x124] sm:$0xf0]  ;;  %v1952_v1 = vld [vmem:[%s2855_s27 + $0x128] sm:$0xf0]  ;;  %v1947_v3 = vor.u32 %v2105_v59, %v1944_v61  ;;  %v1910_v5 = vld [vmem:[%s2855_s27 + $0xc0] sm:$0xf] }
  0x78   : > { %701 = vmatpush.msra.mxu2 %v674_v20  ;;  %724 = vmatpush.msra.mxu3 %v666_v21  ;;  %v1951_v4 = vor.u32 %v2110_v63, %v1950_v62  ;;  %v2101_v6 = vld [vmem:[%s2855_s27 + $0xdc] sm:$0xf0]  ;;  %v2097_v7 = vld [vmem:[%s2855_s27 + $0xc4] sm:$0xf]  ;;  %v1955_v8 = vor.u32 %v2106_v0, %v1952_v1  ;;  %v1918_v10 = vld [vmem:[%s2855_s27 + $0xc8] sm:$0xf] }
  0x79   : > { %v1912_v9 = vld [vmem:[%s2855_s27 + $0xe0] sm:$0xf0]  ;;  %v2102_v11 = vld [vmem:[%s2855_s27 + $0xe4] sm:$0xf0]  ;;  %v2098_v12 = vld [vmem:[%s2855_s27 + $0xcc] sm:$0xf]  ;;  %v1911_v14 = vor.u32 %v2101_v6, %v1910_v5 }
  0x7a   : > { %1154 = vmatpush.bf16.msrb.mxu2 %v2047_v30  ;;  %1167 = vmatpush.bf16.msrb.mxu3 %v2051_v34  ;;  %v1920_v13 = vld [vmem:[%s2855_s27 + $0xe8] sm:$0xf0]  ;;  %v1915_v15 = vor.u32 %v2097_v7, %v1912_v9  ;;  %v1919_v16 = vor.u32 %v2102_v11, %v1918_v10  ;;  %v1878_v17 = vld [vmem:[%s2855_s27 + $0x80] sm:$0xf]  ;;  %v2089_v19 = vld [vmem:[%s2855_s27 + $0x84] sm:$0xf] }
  0x7b   : > { %1130 = vmatpush.bf16.msrb.mxu0 %v1975_v51  ;;  %1143 = vmatpush.bf16.msrb.mxu1 %v1979_v55  ;;  %v2093_v18 = vld [vmem:[%s2855_s27 + $0x9c] sm:$0xf0]  ;;  %v1923_v20 = vor.u32 %v2098_v12, %v1920_v13  ;;  %v1880_v21 = vld [vmem:[%s2855_s27 + $0xa0] sm:$0xf0]  ;;  %v1886_v22 = vld [vmem:[%s2855_s27 + $0x88] sm:$0xf] }
  0x7c   : > { %v2094_v23 = vld [vmem:[%s2855_s27 + $0xa4] sm:$0xf0]  ;;  %v2090_v24 = vld [vmem:[%s2855_s27 + $0x8c] sm:$0xf]  ;;  %v1879_v26 = vor.u32 %v2093_v18, %v1878_v17  ;;  %v1883_v27 = vor.u32 %v2089_v19, %v1880_v21  ;;  %v1846_v29 = vld [vmem:[%s2855_s27 + $0x40] sm:$0xf] }
  0x7d   : > { %v1888_v25 = vld [vmem:[%s2855_s27 + $0xa8] sm:$0xf0]  ;;  %v1887_v28 = vor.u32 %v2094_v23, %v1886_v22  ;;  %v2085_v30 = vld [vmem:[%s2855_s27 + $0x5c] sm:$0xf0]  ;;  %v2081_v31 = vld [vmem:[%s2855_s27 + $0x44] sm:$0xf] }
  0x7e   : > { %1155 = vmatpush.bf16.msrb.mxu2 %v2015_v43  ;;  %1168 = vmatpush.bf16.msrb.mxu3 %v2019_v47  ;;  %v1891_v32 = vor.u32 %v2090_v24, %v1888_v25  ;;  %v1848_v33 = vld [vmem:[%s2855_s27 + $0x60] sm:$0xf0]  ;;  %v1854_v34 = vld [vmem:[%s2855_s27 + $0x48] sm:$0xf]  ;;  %v2082_v36 = vld [vmem:[%s2855_s27 + $0x4c] sm:$0xf]  ;;  %v1847_v38 = vor.u32 %v2085_v30, %v1846_v29 }
  0x7f   : > { %1131 = vmatpush.bf16.msrb.mxu0 %v1943_v2  ;;  %1144 = vmatpush.bf16.msrb.mxu1 %v1947_v3  ;;  %v2086_v35 = vld [vmem:[%s2855_s27 + $0x64] sm:$0xf0]  ;;  %v1856_v37 = vld [vmem:[%s2855_s27 + $0x68] sm:$0xf0]  ;;  %v2268_v39 = vld [vmem:[#allocation9] ss:$0 sm:$0xff]  ;;  %v1851_v40 = vor.u32 %v2081_v31, %v1848_v33 }
  0x80   : > { %v1855_v41 = vor.u32 %v2086_v35, %v1854_v34  ;;  %v1814_v42 = vld [vmem:[%s2855_s27] sm:$0xf]  ;;  %v1859_v44 = vor.u32 %v2082_v36, %v1856_v37  ;;  %v2073_v45 = vld [vmem:[%s2855_s27 + $0x4] sm:$0xf]  ;;  %v1822_v47 = vld [vmem:[%s2855_s27 + $0x8] sm:$0xf] }
  0x81   : > { %v2077_v43 = vld [vmem:[%s2855_s27 + $0x1c] sm:$0xf0]  ;;  %v1816_v46 = vld [vmem:[%s2855_s27 + $0x20] sm:$0xf0]  ;;  %v2078_v48 = vld [vmem:[%s2855_s27 + $0x24] sm:$0xf0] }
  0x82   : > { %1156 = vmatpush.bf16.msrb.mxu2 %v1983_v56  ;;  %1169 = vmatpush.bf16.msrb.mxu3 %v1987_v60  ;;  %v2074_v49 = vld [vmem:[%s2855_s27 + $0xc] sm:$0xf]  ;;  %v1815_v53 = vor.u32 %v2077_v43, %v1814_v42  ;;  %v2054_v54 = vld [vmem:[%s2855_s27 + $0x1d0] sm:$0xf]  ;;  %v2131_v56 = vld [vmem:[%s2855_s27 + $0x1d4] sm:$0xf]  ;;  %v1819_v62 = vor.u32 %v2073_v45, %v1816_v46  ;;  %v1823_v63 = vor.u32 %v2078_v48, %v1822_v47 }
  0x83   : > { %1132 = vmatpush.bf16.msrb.mxu0 %v1911_v14  ;;  %1145 = vmatpush.bf16.msrb.mxu1 %v1915_v15  ;;  %v1824_v50 = vld [vmem:[%s2855_s27 + $0x28] sm:$0xf0]  ;;  %v2135_v55 = vld [vmem:[%s2855_s27 + $0x1ec] sm:$0xf0]  ;;  %v2056_v59 = vld [vmem:[%s2855_s27 + $0x1f0] sm:$0xf0] }
  0x84   : > { %v2062_v60 = vld [vmem:[%s2855_s27 + $0x1d8] sm:$0xf]  ;;  %v2132_v0 = vld [vmem:[%s2855_s27 + $0x1dc] sm:$0xf]  ;;  %v2055_v5 = vor.u32 %v2135_v55, %v2054_v54  ;;  %v2059_v6 = vor.u32 %v2131_v56, %v2056_v59  ;;  %v2127_v9 = vld [vmem:[%s2855_s27 + $0x1ac] sm:$0xf0] }
  0x85   : > { %v2136_v61 = vld [vmem:[%s2855_s27 + $0x1f4] sm:$0xf0]  ;;  %v2064_v1 = vld [vmem:[%s2855_s27 + $0x1f8] sm:$0xf0]  ;;  %v2123_v10 = vld [vmem:[%s2855_s27 + $0x194] sm:$0xf] }
  0x86   : > { %1157 = vmatpush.bf16.msrb.mxu2 %v1951_v4  ;;  %1170 = vmatpush.bf16.msrb.mxu3 %v1955_v8  ;;  %v1827_v4 = vor.u32 %v2074_v49, %v1824_v50  ;;  %v2063_v7 = vor.u32 %v2136_v61, %v2062_v60  ;;  %v2022_v8 = vld [vmem:[%s2855_s27 + $0x190] sm:$0xf]  ;;  %v2067_v11 = vor.u32 %v2132_v0, %v2064_v1  ;;  %v2024_v12 = vld [vmem:[%s2855_s27 + $0x1b0] sm:$0xf0]  ;;  %v2030_v13 = vld [vmem:[%s2855_s27 + $0x198] sm:$0xf] }
  0x87   : > { %1133 = vmatpush.bf16.msrb.mxu0 %v1879_v26  ;;  %1146 = vmatpush.bf16.msrb.mxu1 %v1883_v27  ;;  %v2128_v14 = vld [vmem:[%s2855_s27 + $0x1b4] sm:$0xf0]  ;;  %v2124_v15 = vld [vmem:[%s2855_s27 + $0x19c] sm:$0xf]  ;;  %v2023_v17 = vor.u32 %v2127_v9, %v2022_v8  ;;  %v2027_v18 = vor.u32 %v2123_v10, %v2024_v12  ;;  %v1990_v21 = vld [vmem:[%s2855_s27 + $0x150] sm:$0xf] }
  0x88   : > { %v2031_v19 = vor.u32 %v2128_v14, %v2030_v13  ;;  %v2119_v22 = vld [vmem:[%s2855_s27 + $0x16c] sm:$0xf0]  ;;  %v2115_v23 = vld [vmem:[%s2855_s27 + $0x154] sm:$0xf]  ;;  %v1998_v26 = vld [vmem:[%s2855_s27 + $0x158] sm:$0xf] }
  0x89   : > { %v1991_v24 = vor.u32 %v2119_v22, %v1990_v21  ;;  %v1992_v25 = vld [vmem:[%s2855_s27 + $0x170] sm:$0xf0]  ;;  %v2120_v27 = vld [vmem:[%s2855_s27 + $0x174] sm:$0xf0]  ;;  %v2116_v30 = vld [vmem:[%s2855_s27 + $0x15c] sm:$0xf] }
  0x8a   : > { %1158 = vmatpush.bf16.msrb.mxu2 %v1919_v16  ;;  %1171 = vmatpush.bf16.msrb.mxu3 %v1923_v20  ;;  %v2032_v16 = vld [vmem:[%s2855_s27 + $0x1b8] sm:$0xf0]  ;;  %v1999_v29 = vor.u32 %v2120_v27, %v1998_v26  ;;  %v1958_v33 = vld [vmem:[%s2855_s27 + $0x110] sm:$0xf]  ;;  %v2107_v35 = vld [vmem:[%s2855_s27 + $0x114] sm:$0xf] }
  0x8b   : > { %1134 = vmatpush.bf16.msrb.mxu0 %v1847_v38  ;;  %1147 = vmatpush.bf16.msrb.mxu1 %v1851_v40  ;;  %v2035_v20 = vor.u32 %v2124_v15, %v2032_v16  ;;  %v2000_v31 = vld [vmem:[%s2855_s27 + $0x178] sm:$0xf0]  ;;  %v2111_v34 = vld [vmem:[%s2855_s27 + $0x12c] sm:$0xf0]  ;;  %v1960_v37 = vld [vmem:[%s2855_s27 + $0x130] sm:$0xf0] }
  0x8c   : > { %v1959_v36 = vor.u32 %v2111_v34, %v1958_v33  ;;  %v1966_v38 = vld [vmem:[%s2855_s27 + $0x118] sm:$0xf]  ;;  %v1963_v40 = vor.u32 %v2107_v35, %v1960_v37  ;;  %v2108_v42 = vld [vmem:[%s2855_s27 + $0x11c] sm:$0xf]  ;;  %v1926_v45 = vld [vmem:[%s2855_s27 + $0xd0] sm:$0xf] }
  0x8d   : > { %v1968_v43 = vld [vmem:[%s2855_s27 + $0x138] sm:$0xf0]  ;;  %v2103_v46 = vld [vmem:[%s2855_s27 + $0xec] sm:$0xf0]  ;;  %v2099_v47 = vld [vmem:[%s2855_s27 + $0xd4] sm:$0xf] }
  0x8e   : > { %1159 = vmatpush.bf16.msrb.mxu2 %v1887_v28  ;;  %1172 = vmatpush.bf16.msrb.mxu3 %v1891_v32  ;;  %v1995_v28 = vor.u32 %v2115_v23, %v1992_v25  ;;  %v2003_v32 = vor.u32 %v2116_v30, %v2000_v31  ;;  %v1927_v48 = vor.u32 %v2103_v46, %v1926_v45  ;;  %v1928_v49 = vld [vmem:[%s2855_s27 + $0xf0] sm:$0xf0]  ;;  %v1934_v50 = vld [vmem:[%s2855_s27 + $0xd8] sm:$0xf]  ;;  %v2100_v54 = vld [vmem:[%s2855_s27 + $0xdc] sm:$0xf] }
  0x8f   : > { %1135 = vmatpush.bf16.msrb.mxu0 %v1815_v53  ;;  %1148 = vmatpush.bf16.msrb.mxu1 %v1819_v62  ;;  %v1936_v55 = vld [vmem:[%s2855_s27 + $0xf8] sm:$0xf0]  ;;  %v1894_v56 = vld [vmem:[%s2855_s27 + $0x90] sm:$0xf]  ;;  %v2091_v59 = vld [vmem:[%s2855_s27 + $0x94] sm:$0xf] }
  0x90   : > { %v1896_v60 = vld [vmem:[%s2855_s27 + $0xb0] sm:$0xf0]  ;;  %v2096_v0 = vld [vmem:[%s2855_s27 + $0xb4] sm:$0xf0]  ;;  %v2092_v1 = vld [vmem:[%s2855_s27 + $0x9c] sm:$0xf] }
  0x91   : > { %v1899_v62 = vor.u32 %v2091_v59, %v1896_v60  ;;  %v1864_v8 = vld [vmem:[%s2855_s27 + $0x70] sm:$0xf0]  ;;  %v1870_v9 = vld [vmem:[%s2855_s27 + $0x58] sm:$0xf]  ;;  %v2084_v12 = vld [vmem:[%s2855_s27 + $0x5c] sm:$0xf] }
  0x92   : > { %1160 = vmatpush.bf16.msrb.mxu2 %v1855_v41  ;;  %1173 = vmatpush.bf16.msrb.mxu3 %v1859_v44  ;;  %v1971_v44 = vor.u32 %v2108_v42, %v1968_v43  ;;  %v1872_v13 = vld [vmem:[%s2855_s27 + $0x78] sm:$0xf0]  ;;  %v1830_v16 = vld [vmem:[%s2855_s27 + $0x10] sm:$0xf]  ;;  %v1838_v21 = vld [vmem:[%s2855_s27 + $0x18] sm:$0xf] }
  0x93   : > { %1180 = vmatpush.bf16.msra.mxu0 %v2055_v5  ;;  %1193 = vmatpush.bf16.msra.mxu1 %v2059_v6  ;;  %v2087_v5 = vld [vmem:[%s2855_s27 + $0x6c] sm:$0xf0]  ;;  %v2080_v22 = vld [vmem:[%s2855_s27 + $0x34] sm:$0xf0]  ;;  %v2076_v23 = vld [vmem:[%s2855_s27 + $0x1c] sm:$0xf] }
  0x94   : > { %v1839_v27 = vor.u32 %v2080_v22, %v1838_v21  ;;  %v736_v37 = vld [vmem:[#allocation2] sm:$0xff]  ;;  %v737_v42 = vld [vmem:[#allocation2 + $0x18] sm:$0xff]  ;;  %v738_v43 = vld [vmem:[#allocation2 + $0x10] sm:$0xff] }
  0x95   : > { %v742_v59 = vld [vmem:[#allocation2 + $0x38] sm:$0xff] }
  0x96   : > { %1161 = vmatpush.bf16.msrb.mxu2 %v1823_v63  ;;  %1174 = vmatpush.bf16.msrb.mxu3 %v1827_v4  ;;  %v1902_v63 = vld [vmem:[%s2855_s27 + $0x98] sm:$0xf]  ;;  %v1862_v4 = vld [vmem:[%s2855_s27 + $0x50] sm:$0xf] }
  0x97   : > { %1181 = vmatpush.bf16.msra.mxu0 %v2023_v17  ;;  %1194 = vmatpush.bf16.msra.mxu1 %v2027_v18  ;;  %v1863_v10 = vor.u32 %v2087_v5, %v1862_v4  ;;  %v2079_v17 = vld [vmem:[%s2855_s27 + $0x2c] sm:$0xf0]  ;;  %v2075_v18 = vld [vmem:[%s2855_s27 + $0x14] sm:$0xf] }
  0x98   : > { %v1831_v25 = vor.u32 %v2079_v17, %v1830_v16 }
  0x9b   : > { %1182 = vmatpush.bf16.msra.mxu0 %v1991_v24  ;;  %1195 = vmatpush.bf16.msra.mxu1 %v1995_v28  ;;  %v1840_v24 = vld [vmem:[%s2855_s27 + $0x38] sm:$0xf0] }
  0x9c   : > { %v1843_v28 = vor.u32 %v2076_v23, %v1840_v24 }
  0x9f   : > { %1183 = vmatpush.bf16.msra.mxu0 %v1959_v36  ;;  %1196 = vmatpush.bf16.msra.mxu1 %v1963_v40  ;;  %v735_v36 = vld [vmem:[#allocation2 + $0x30] sm:$0xff] }
  0xa3   : > { %1184 = vmatpush.bf16.msra.mxu0 %v1927_v48 }
  0xe8   : > { %v638_v51 = vpop.f32.mrf.mxu0  ;;  %v662_v52 = vpop.f32.mrf.mxu1 }
  0xe9   : > { %v639_v57 = vadd.f32 %v2268_v39, %v638_v51  ;;  %v663_v58 = vadd.f32 %v2268_v39, %v662_v52  ;;  %v2112_v39 = vld [vmem:[%s2855_s27 + $0x134] sm:$0xf0]  ;;  %v1931_v52 = vor.u32 %v2099_v47, %v1928_v49 }
  0xea   : > { %v1967_v41 = vor.u32 %v2112_v39, %v1966_v38  ;;  %v2104_v51 = vld [vmem:[%s2855_s27 + $0xf4] sm:$0xf0] }
  0xeb   : > { %v641_v2 = vmax.f32 %v639_v57, 0.0  ;;  %v665_v3 = vmax.f32 %v663_v58, 0.0  ;;  %v1935_v53 = vor.u32 %v2104_v51, %v1934_v50  ;;  %v1939_v57 = vor.u32 %v2100_v54, %v1936_v55  ;;  %v2095_v58 = vld [vmem:[%s2855_s27 + $0xac] sm:$0xf0]  ;;  %1197 = vmatpush.bf16.msra.mxu1 %v1931_v52 }
  0xec   : > { %v1895_v61 = vor.u32 %v2095_v58, %v1894_v56  ;;  %v739_v50 = vld [vmem:[#allocation2 + $0x8] sm:$0xff]  ;;  %v740_v51 = vld [vmem:[#allocation2 + $0x20] sm:$0xff] }
  0xed   : > { %1810 = vmatmul.msk.f32.vlgmr.msra.gmra.mxu2 %vm682_vm1, %v665_v3  ;;  %1811 = vmatmul.msk.f32.vlgmr.msra.gmra.mxu3 %vm682_vm1, %v641_v2  ;;  %v1903_v2 = vor.u32 %v2096_v0, %v1902_v63  ;;  %v1904_v3 = vld [vmem:[%s2855_s27 + $0xb8] sm:$0xf0]  ;;  %v741_v58 = vld [vmem:[#allocation2 + $0x28] sm:$0xff] }
  0xee   : > { %1206 = vmatpush.bf16.msra.mxu2 %v2063_v7  ;;  %1219 = vmatpush.bf16.msra.mxu3 %v2067_v11  ;;  %v1907_v6 = vor.u32 %v2092_v1, %v1904_v3  ;;  %v2083_v7 = vld [vmem:[%s2855_s27 + $0x54] sm:$0xf]  ;;  %v2088_v11 = vld [vmem:[%s2855_s27 + $0x74] sm:$0xf0] }
  0xef   : > { %1185 = vmatpush.bf16.msra.mxu0 %v1895_v61  ;;  %1198 = vmatpush.bf16.msra.mxu1 %v1899_v62  ;;  %v1867_v14 = vor.u32 %v2083_v7, %v1864_v8  ;;  %v1871_v15 = vor.u32 %v2088_v11, %v1870_v9 }
  0xf2   : > { %1207 = vmatpush.bf16.msra.mxu2 %v2031_v19  ;;  %1220 = vmatpush.bf16.msra.mxu3 %v2035_v20  ;;  %v1875_v19 = vor.u32 %v2084_v12, %v1872_v13  ;;  %v1832_v20 = vld [vmem:[%s2855_s27 + $0x30] sm:$0xf0] }
  0xf3   : > { %1186 = vmatpush.bf16.msra.mxu0 %v1863_v10  ;;  %1199 = vmatpush.bf16.msra.mxu1 %v1867_v14  ;;  %v1835_v26 = vor.u32 %v2075_v18, %v1832_v20 }
  0xf6   : > { %1208 = vmatpush.bf16.msra.mxu2 %v1999_v29  ;;  %1221 = vmatpush.bf16.msra.mxu3 %v2003_v32  ;;  %v2269_v29 = vld [vmem:[#allocation14] ss:$0 sm:$0xff] }
  0xf7   : > { %1187 = vmatpush.bf16.msra.mxu0 %v1831_v25  ;;  %1200 = vmatpush.bf16.msra.mxu1 %v1835_v26 }
  0xfa   : > { %1209 = vmatpush.bf16.msra.mxu2 %v1967_v41  ;;  %1222 = vmatpush.bf16.msra.mxu3 %v1971_v44 }
  0xfe   : > { %1210 = vmatpush.bf16.msra.mxu2 %v1935_v53  ;;  %1223 = vmatpush.bf16.msra.mxu3 %v1939_v57 }
 0x102   : > { %1211 = vmatpush.bf16.msra.mxu2 %v1903_v2  ;;  %1224 = vmatpush.bf16.msra.mxu3 %v1907_v6 }
 0x106   : > { %1212 = vmatpush.bf16.msra.mxu2 %v1871_v15  ;;  %1225 = vmatpush.bf16.msra.mxu3 %v1875_v19 }
 0x10a   : > { %1213 = vmatpush.bf16.msra.mxu2 %v1839_v27  ;;  %1226 = vmatpush.bf16.msra.mxu3 %v1843_v28 }
 0x170   : > { %v703_v30 = vpop.f32.mrf.mxu2  ;;  %v726_v31 = vpop.f32.mrf.mxu3 }
 0x171   : > { %v727_v32 = vadd.f32 %v726_v31, %v703_v30 }
 0x173   : > { %v733_v33 = vadd.f32 %v2269_v29, %v727_v32 }
 0x175   : > { %v734_v34 = vmax.f32 %v733_v33, 0.0 }
 0x177   : > { %v743_v35 = vpack.c.bf16 %v734_v34, %v734_v34 }
 0x179   : > { %1136 = vmatmul.bf16.vlgmr.msrb.gmra.mxu0 %v743_v35  ;;  %1149 = vmatmul.bf16.vlgmr.msrb.gmra.mxu1 %v743_v35 }
 0x17a   : > { %1162 = vmatmul.bf16.vlgmr.msrb.gmra.mxu2 %v743_v35  ;;  %1175 = vmatmul.bf16.vlgmr.msrb.gmra.mxu3 %v743_v35 }
 0x189   : > { %1188 = vmatmul.bf16.vlgmr.msra.gmra.mxu0 %v743_v35  ;;  %1201 = vmatmul.bf16.vlgmr.msra.gmra.mxu1 %v743_v35 }
 0x18a   : > { %1214 = vmatmul.bf16.vlgmr.msra.gmra.mxu2 %v743_v35  ;;  %1227 = vmatmul.bf16.vlgmr.msra.gmra.mxu3 %v743_v35 }
 0x1f6   : > { %v1137_v38 = vpop.f32.mrf.mxu0  ;;  %v1150_v39 = vpop.f32.mrf.mxu1 }
 0x1f7   : > { %v1232_v40 = vadd.f32 %v1137_v38, %v735_v36  ;;  %v1233_v41 = vadd.f32 %v1150_v39, %v736_v37 }
 0x1f9   : > { %1240 = vst [vmem:[#allocation2 + $0x30] sm:$0xff] %v1232_v40 }
 0x1fa   : > { %1241 = vst [vmem:[#allocation2] sm:$0xff] %v1233_v41 }
 0x1fd   : > { %v1163_v44 = vpop.f32.mrf.mxu2  ;;  %v1176_v45 = vpop.f32.mrf.mxu3 }
 0x1fe   : > { %v1234_v46 = vadd.f32 %v1163_v44, %v737_v42  ;;  %v1235_v47 = vadd.f32 %v1176_v45, %v738_v43  ;;  %v1139_v48 = vpop.f32.mrf.mxu0  ;;  %v1152_v49 = vpop.f32.mrf.mxu1 }
 0x200   : > { %1242 = vst [vmem:[#allocation2 + $0x18] sm:$0xff] %v1234_v46 }
 0x201   : > { %1243 = vst [vmem:[#allocation2 + $0x10] sm:$0xff] %v1235_v47 }
 0x205   : > { %v1165_v52 = vpop.f32.mrf.mxu2  ;;  %v1178_v53 = vpop.f32.mrf.mxu3 }
 0x206   : > { %v1189_v54 = vpop.f32.mrf.mxu0  ;;  %v1202_v55 = vpop.f32.mrf.mxu1 }
 0x207   : > { %v1236_v56 = vadd.f32 %v1189_v54, %v739_v50  ;;  %v1237_v57 = vadd.f32 %v1202_v55, %v740_v51 }
 0x209   : > { %1244 = vst [vmem:[#allocation2 + $0x8] sm:$0xff] %v1236_v56 }
 0x20a   : > { %1245 = vst [vmem:[#allocation2 + $0x20] sm:$0xff] %v1237_v57 }
 0x20d   : > { %v1215_v60 = vpop.f32.mrf.mxu2  ;;  %v1228_v61 = vpop.f32.mrf.mxu3 }
 0x20e   : > { %v1238_v62 = vadd.f32 %v1215_v60, %v741_v58  ;;  %v1239_v63 = vadd.f32 %v1228_v61, %v742_v59  ;;  %v1191_v0 = vpop.f32.mrf.mxu0  ;;  %v1204_v1 = vpop.f32.mrf.mxu1 }
 0x210   : > { %1246 = vst [vmem:[#allocation2 + $0x28] sm:$0xff] %v1238_v62 }
 0x211   : > { %1247 = vst [vmem:[#allocation2 + $0x38] sm:$0xff] %v1239_v63  ;;  %1251 = sbr.rel (%p2068_p1) target bundleno = 767 (0x2ff), region = 108 }
 0x215   : > { %v1217_v2 = vpop.f32.mrf.mxu2  ;;  %v1230_v3 = vpop.f32.mrf.mxu3 }
 0x216   : > { %v1341_v4 = vld [vmem:[%s3451_s2 + $0x178] sm:$0xff]  ;;  %v1340_v6 = vld [vmem:[%s3451_s2 + $0x170] sm:$0xff]  ;;  %v1339_v10 = vld [vmem:[%s3451_s2 + $0x168] sm:$0xff]  ;;  %vm1605_vm5 = vcmask 7168  }
 0x217   : > { %v1309_v5 = vld [vmem:[%s3451_s2 + $0x78] sm:$0xff]  ;;  %1466 = vmatpush.msra.mxu2 %v1341_v4  ;;  %v1308_v8 = vld [vmem:[%s3451_s2 + $0x70] sm:$0xff]  ;;  %v1307_v12 = vld [vmem:[%s3451_s2 + $0x68] sm:$0xff] }
 0x218   : > { %1426 = vmatpush.msra.mxu0 %v1309_v5  ;;  %v1357_v7 = vld [vmem:[%s3451_s2 + $0x1f8] sm:$0xff]  ;;  %v1356_v11 = vld [vmem:[%s3451_s2 + $0x1f0] sm:$0xff]  ;;  %v1355_v14 = vld [vmem:[%s3451_s2 + $0x1e8] sm:$0xff] }
 0x219   : > { %v1325_v9 = vld [vmem:[%s3451_s2 + $0xf8] sm:$0xff]  ;;  %1486 = vmatpush.msra.mxu3 %v1357_v7  ;;  %1467 = vmatpush.msra.mxu2 %v1340_v6  ;;  %v1324_v13 = vld [vmem:[%s3451_s2 + $0xf0] sm:$0xff]  ;;  %v1338_v15 = vld [vmem:[%s3451_s2 + $0x160] sm:$0xff] }
 0x21a   : > { %1446 = vmatpush.msra.mxu1 %v1325_v9  ;;  %1427 = vmatpush.msra.mxu0 %v1308_v8  ;;  %v1306_v16 = vld [vmem:[%s3451_s2 + $0x60] sm:$0xff]  ;;  %v1323_v17 = vld [vmem:[%s3451_s2 + $0xe8] sm:$0xff]  ;;  %v1337_v20 = vld [vmem:[%s3451_s2 + $0x158] sm:$0xff] }
 0x21b   : > { %1487 = vmatpush.msra.mxu3 %v1356_v11  ;;  %1468 = vmatpush.msra.mxu2 %v1339_v10  ;;  %v1354_v18 = vld [vmem:[%s3451_s2 + $0x1e0] sm:$0xff]  ;;  %v1305_v21 = vld [vmem:[%s3451_s2 + $0x58] sm:$0xff]  ;;  %v1336_v24 = vld [vmem:[%s3451_s2 + $0x150] sm:$0xff] }
 0x21c   : > { %1447 = vmatpush.msra.mxu1 %v1324_v13  ;;  %1428 = vmatpush.msra.mxu0 %v1307_v12  ;;  %v1322_v19 = vld [vmem:[%s3451_s2 + $0xe0] sm:$0xff]  ;;  %v1353_v22 = vld [vmem:[%s3451_s2 + $0x1d8] sm:$0xff]  ;;  %v1304_v25 = vld [vmem:[%s3451_s2 + $0x50] sm:$0xff] }
 0x21d   : > { %1488 = vmatpush.msra.mxu3 %v1355_v14  ;;  %1469 = vmatpush.msra.mxu2 %v1338_v15  ;;  %v1321_v23 = vld [vmem:[%s3451_s2 + $0xd8] sm:$0xff]  ;;  %v1352_v26 = vld [vmem:[%s3451_s2 + $0x1d0] sm:$0xff]  ;;  %v1335_v28 = vld [vmem:[%s3451_s2 + $0x148] sm:$0xff] }
 0x21e   : > { %1448 = vmatpush.msra.mxu1 %v1323_v17  ;;  %1429 = vmatpush.msra.mxu0 %v1306_v16  ;;  %v1320_v27 = vld [vmem:[%s3451_s2 + $0xd0] sm:$0xff]  ;;  %v1303_v29 = vld [vmem:[%s3451_s2 + $0x48] sm:$0xff]  ;;  %v1334_v32 = vld [vmem:[%s3451_s2 + $0x140] sm:$0xff] }
 0x21f   : > { %1489 = vmatpush.msra.mxu3 %v1354_v18  ;;  %1470 = vmatpush.msra.mxu2 %v1337_v20  ;;  %v1351_v30 = vld [vmem:[%s3451_s2 + $0x1c8] sm:$0xff]  ;;  %v1302_v33 = vld [vmem:[%s3451_s2 + $0x40] sm:$0xff]  ;;  %v1333_v36 = vld [vmem:[%s3451_s2 + $0x138] sm:$0xff] }
 0x220   : > { %1449 = vmatpush.msra.mxu1 %v1322_v19  ;;  %1430 = vmatpush.msra.mxu0 %v1305_v21  ;;  %v1319_v31 = vld [vmem:[%s3451_s2 + $0xc8] sm:$0xff]  ;;  %v1350_v34 = vld [vmem:[%s3451_s2 + $0x1c0] sm:$0xff]  ;;  %v1301_v37 = vld [vmem:[%s3451_s2 + $0x38] sm:$0xff] }
 0x221   : > { %1490 = vmatpush.msra.mxu3 %v1353_v22  ;;  %1471 = vmatpush.msra.mxu2 %v1336_v24  ;;  %v1318_v35 = vld [vmem:[%s3451_s2 + $0xc0] sm:$0xff]  ;;  %v1349_v38 = vld [vmem:[%s3451_s2 + $0x1b8] sm:$0xff]  ;;  %v1332_v40 = vld [vmem:[%s3451_s2 + $0x130] sm:$0xff] }
 0x222   : > { %1450 = vmatpush.msra.mxu1 %v1321_v23  ;;  %1431 = vmatpush.msra.mxu0 %v1304_v25  ;;  %v1317_v39 = vld [vmem:[%s3451_s2 + $0xb8] sm:$0xff]  ;;  %v1300_v41 = vld [vmem:[%s3451_s2 + $0x30] sm:$0xff]  ;;  %v1331_v44 = vld [vmem:[%s3451_s2 + $0x128] sm:$0xff] }
 0x223   : > { %1491 = vmatpush.msra.mxu3 %v1352_v26  ;;  %1472 = vmatpush.msra.mxu2 %v1335_v28  ;;  %v1348_v42 = vld [vmem:[%s3451_s2 + $0x1b0] sm:$0xff]  ;;  %v1299_v45 = vld [vmem:[%s3451_s2 + $0x28] sm:$0xff]  ;;  %v1330_v48 = vld [vmem:[%s3451_s2 + $0x120] sm:$0xff] }
 0x224   : > { %1451 = vmatpush.msra.mxu1 %v1320_v27  ;;  %1432 = vmatpush.msra.mxu0 %v1303_v29  ;;  %v1316_v43 = vld [vmem:[%s3451_s2 + $0xb0] sm:$0xff]  ;;  %v1347_v46 = vld [vmem:[%s3451_s2 + $0x1a8] sm:$0xff]  ;;  %v1298_v49 = vld [vmem:[%s3451_s2 + $0x20] sm:$0xff] }
 0x225   : > { %1492 = vmatpush.msra.mxu3 %v1351_v30  ;;  %1473 = vmatpush.msra.mxu2 %v1334_v32  ;;  %v1315_v47 = vld [vmem:[%s3451_s2 + $0xa8] sm:$0xff]  ;;  %v1346_v50 = vld [vmem:[%s3451_s2 + $0x1a0] sm:$0xff]  ;;  %v1329_v52 = vld [vmem:[%s3451_s2 + $0x118] sm:$0xff] }
 0x226   : > { %1452 = vmatpush.msra.mxu1 %v1319_v31  ;;  %1433 = vmatpush.msra.mxu0 %v1302_v33  ;;  %v1314_v51 = vld [vmem:[%s3451_s2 + $0xa0] sm:$0xff]  ;;  %v1297_v53 = vld [vmem:[%s3451_s2 + $0x18] sm:$0xff]  ;;  %v1328_v56 = vld [vmem:[%s3451_s2 + $0x110] sm:$0xff] }
 0x227   : > { %1493 = vmatpush.msra.mxu3 %v1350_v34  ;;  %1474 = vmatpush.msra.mxu2 %v1333_v36  ;;  %v1345_v54 = vld [vmem:[%s3451_s2 + $0x198] sm:$0xff]  ;;  %v1296_v57 = vld [vmem:[%s3451_s2 + $0x10] sm:$0xff]  ;;  %v1327_v60 = vld [vmem:[%s3451_s2 + $0x108] sm:$0xff] }
 0x228   : > { %1453 = vmatpush.msra.mxu1 %v1318_v35  ;;  %1434 = vmatpush.msra.mxu0 %v1301_v37  ;;  %v1313_v55 = vld [vmem:[%s3451_s2 + $0x98] sm:$0xff]  ;;  %v1344_v58 = vld [vmem:[%s3451_s2 + $0x190] sm:$0xff]  ;;  %v1295_v61 = vld [vmem:[%s3451_s2 + $0x8] sm:$0xff] }
 0x229   : > { %1494 = vmatpush.msra.mxu3 %v1349_v38  ;;  %1475 = vmatpush.msra.mxu2 %v1332_v40  ;;  %v1312_v59 = vld [vmem:[%s3451_s2 + $0x90] sm:$0xff]  ;;  %v1343_v62 = vld [vmem:[%s3451_s2 + $0x188] sm:$0xff]  ;;  %v1326_v0 = vld [vmem:[%s3451_s2 + $0x100] sm:$0xff] }
 0x22a   : > { %1454 = vmatpush.msra.mxu1 %v1317_v39  ;;  %1435 = vmatpush.msra.mxu0 %v1300_v41  ;;  %v1311_v63 = vld [vmem:[%s3451_s2 + $0x88] sm:$0xff]  ;;  %v1294_v1 = vld [vmem:[%s3451_s2] sm:$0xff]  ;;  %v1405_v2 = vld [vmem:[%s3451_s2 + $0x378] sm:$0xff] }
 0x22b   : > { %1495 = vmatpush.msra.mxu3 %v1348_v42  ;;  %1476 = vmatpush.msra.mxu2 %v1331_v44  ;;  %v1342_v3 = vld [vmem:[%s3451_s2 + $0x180] sm:$0xff]  ;;  %v1373_v4 = vld [vmem:[%s3451_s2 + $0x278] sm:$0xff]  ;;  %v1404_v6 = vld [vmem:[%s3451_s2 + $0x370] sm:$0xff] }
 0x22c   : > { %1455 = vmatpush.msra.mxu1 %v1316_v43  ;;  %1436 = vmatpush.msra.mxu0 %v1299_v45  ;;  %v1421_v5 = vld [vmem:[%s3451_s2 + $0x3f8] sm:$0xff]  ;;  %v1310_v7 = vld [vmem:[%s3451_s2 + $0x80] sm:$0xff]  ;;  %v1372_v8 = vld [vmem:[%s3451_s2 + $0x270] sm:$0xff] }
 0x22d   : > { %1496 = vmatpush.msra.mxu3 %v1347_v46  ;;  %1477 = vmatpush.msra.mxu2 %v1330_v48  ;;  %v1389_v9 = vld [vmem:[%s3451_s2 + $0x2f8] sm:$0xff]  ;;  %v1403_v10 = vld [vmem:[%s3451_s2 + $0x368] sm:$0xff]  ;;  %v1420_v11 = vld [vmem:[%s3451_s2 + $0x3f0] sm:$0xff] }
 0x22e   : > { %1456 = vmatpush.msra.mxu1 %v1315_v47  ;;  %1437 = vmatpush.msra.mxu0 %v1298_v49  ;;  %v1371_v12 = vld [vmem:[%s3451_s2 + $0x268] sm:$0xff]  ;;  %v1388_v13 = vld [vmem:[%s3451_s2 + $0x2f0] sm:$0xff]  ;;  %v1402_v14 = vld [vmem:[%s3451_s2 + $0x360] sm:$0xff] }
 0x22f   : > { %1497 = vmatpush.msra.mxu3 %v1346_v50  ;;  %1478 = vmatpush.msra.mxu2 %v1329_v52  ;;  %v1419_v15 = vld [vmem:[%s3451_s2 + $0x3e8] sm:$0xff]  ;;  %v1370_v16 = vld [vmem:[%s3451_s2 + $0x260] sm:$0xff]  ;;  %v1401_v18 = vld [vmem:[%s3451_s2 + $0x358] sm:$0xff] }
 0x230   : > { %1457 = vmatpush.msra.mxu1 %v1314_v51  ;;  %1438 = vmatpush.msra.mxu0 %v1297_v53  ;;  %v1387_v17 = vld [vmem:[%s3451_s2 + $0x2e8] sm:$0xff]  ;;  %v1418_v19 = vld [vmem:[%s3451_s2 + $0x3e0] sm:$0xff]  ;;  %v1369_v20 = vld [vmem:[%s3451_s2 + $0x258] sm:$0xff] }
 0x231   : > { %1498 = vmatpush.msra.mxu3 %v1345_v54  ;;  %1479 = vmatpush.msra.mxu2 %v1328_v56  ;;  %v1386_v21 = vld [vmem:[%s3451_s2 + $0x2e0] sm:$0xff]  ;;  %v1400_v22 = vld [vmem:[%s3451_s2 + $0x350] sm:$0xff]  ;;  %v1417_v23 = vld [vmem:[%s3451_s2 + $0x3d8] sm:$0xff] }
 0x232   : > { %1458 = vmatpush.msra.mxu1 %v1313_v55  ;;  %1439 = vmatpush.msra.mxu0 %v1296_v57  ;;  %v1368_v24 = vld [vmem:[%s3451_s2 + $0x250] sm:$0xff]  ;;  %v1385_v25 = vld [vmem:[%s3451_s2 + $0x2d8] sm:$0xff]  ;;  %v1399_v27 = vld [vmem:[%s3451_s2 + $0x348] sm:$0xff] }
 0x233   : > { %1499 = vmatpush.msra.mxu3 %v1344_v58  ;;  %1480 = vmatpush.msra.mxu2 %v1327_v60  ;;  %v3257_v26 = vld [vmem:[#allocation17] sm:$0xff]  ;;  %v1367_v29 = vld [vmem:[%s3451_s2 + $0x248] sm:$0xff]  ;;  %v1398_v31 = vld [vmem:[%s3451_s2 + $0x340] sm:$0xff] }
 0x234   : > { %1459 = vmatpush.msra.mxu1 %v1312_v59  ;;  %1440 = vmatpush.msra.mxu0 %v1295_v61  ;;  %v1416_v28 = vld [vmem:[%s3451_s2 + $0x3d0] sm:$0xff]  ;;  %v1415_v32 = vld [vmem:[%s3451_s2 + $0x3c8] sm:$0xff]  ;;  %v1264_v33 = vperm.slane %v3257_v26, 2  ;;  %v1366_v34 = vld [vmem:[%s3451_s2 + $0x240] sm:$0xff]  ;;  %v1262_v39 = vperm.slane %v3257_v26, 0  ;;  %v1265_v43 = vperm.slane %v3257_v26, 3 }
 0x235   : > { %1500 = vmatpush.msra.mxu3 %v1343_v62  ;;  %1481 = vmatpush.msra.mxu2 %v1326_v0  ;;  %v1384_v30 = vld [vmem:[%s3451_s2 + $0x2d0] sm:$0xff]  ;;  %v1383_v35 = vld [vmem:[%s3451_s2 + $0x2c8] sm:$0xff]  ;;  %v1254_v36 = vld [vmem:[#allocation2 + $0x18] sm:$0xff]  ;;  %v1263_v50 = vperm.slane %v3257_v26, 1 }
 0x236   : > { %1460 = vmatpush.msra.mxu1 %v1311_v63  ;;  %1441 = vmatpush.msra.mxu0 %v1294_v1  ;;  %v1397_v37 = vld [vmem:[%s3451_s2 + $0x338] sm:$0xff]  ;;  %v1414_v38 = vld [vmem:[%s3451_s2 + $0x3c0] sm:$0xff]  ;;  %v1252_v42 = vld [vmem:[#allocation2 + $0x30] sm:$0xff]  ;;  %v1280_v46 = vadd.f32 %v1264_v33, %v1254_v36 }
 0x237   : > { %1546 = vmatpush.msrb.mxu2 %v1405_v2  ;;  %1501 = vmatpush.msra.mxu3 %v1342_v3  ;;  %v1365_v40 = vld [vmem:[%s3451_s2 + $0x238] sm:$0xff]  ;;  %v1382_v41 = vld [vmem:[%s3451_s2 + $0x2c0] sm:$0xff]  ;;  %v1396_v44 = vld [vmem:[%s3451_s2 + $0x330] sm:$0xff]  ;;  %v1278_v53 = vadd.f32 %v1262_v39, %v1252_v42  ;;  %v1268_v2 = vperm.slane %v3257_v26, 6 }
 0x238   : > { %1506 = vmatpush.msrb.mxu0 %v1373_v4  ;;  %1461 = vmatpush.msra.mxu1 %v1310_v7  ;;  %v1413_v45 = vld [vmem:[%s3451_s2 + $0x3b8] sm:$0xff]  ;;  %v1255_v47 = vld [vmem:[#allocation2 + $0x10] sm:$0xff]  ;;  %v1395_v51 = vld [vmem:[%s3451_s2 + $0x328] sm:$0xff]  ;;  %v1288_v60 = vmax.f32 %v1280_v46, 0.0 }
 0x239   : > { %1566 = vmatpush.msrb.mxu3 %v1421_v5  ;;  %1547 = vmatpush.msrb.mxu2 %v1404_v6  ;;  %v1364_v48 = vld [vmem:[%s3451_s2 + $0x230] sm:$0xff]  ;;  %v1381_v49 = vld [vmem:[%s3451_s2 + $0x2b8] sm:$0xff]  ;;  %v1253_v54 = vld [vmem:[#allocation2] sm:$0xff]  ;;  %v1281_v57 = vadd.f32 %v1265_v43, %v1255_v47  ;;  %v1286_v1 = vmax.f32 %v1278_v53, 0.0 }
 0x23a   : > { %1507 = vmatpush.msrb.mxu0 %v1372_v8  ;;  %1526 = vmatpush.msrb.mxu1 %v1389_v9  ;;  %v1412_v52 = vld [vmem:[%s3451_s2 + $0x3b0] sm:$0xff]  ;;  %v1363_v55 = vld [vmem:[%s3451_s2 + $0x228] sm:$0xff]  ;;  %v1394_v58 = vld [vmem:[%s3451_s2 + $0x320] sm:$0xff]  ;;  %v1279_v62 = vadd.f32 %v1263_v50, %v1253_v54  ;;  %v1266_v8 = vperm.slane %v3257_v26, 4  ;;  %v1269_v9 = vperm.slane %v3257_v26, 7 }
 0x23b   : > { %1548 = vmatpush.msrb.mxu2 %v1403_v10  ;;  %1567 = vmatpush.msrb.mxu3 %v1420_v11  ;;  %v1380_v56 = vld [vmem:[%s3451_s2 + $0x2b0] sm:$0xff]  ;;  %v1411_v59 = vld [vmem:[%s3451_s2 + $0x3a8] sm:$0xff]  ;;  %v1362_v61 = vld [vmem:[%s3451_s2 + $0x220] sm:$0xff]  ;;  %v1289_v4 = vmax.f32 %v1281_v57, 0.0 }
 0x23c   : > { %1508 = vmatpush.msrb.mxu0 %v1371_v12  ;;  %1527 = vmatpush.msrb.mxu1 %v1388_v13  ;;  %v1379_v63 = vld [vmem:[%s3451_s2 + $0x2a8] sm:$0xff]  ;;  %v1393_v0 = vld [vmem:[%s3451_s2 + $0x318] sm:$0xff]  ;;  %v1410_v3 = vld [vmem:[%s3451_s2 + $0x3a0] sm:$0xff]  ;;  %v1287_v11 = vmax.f32 %v1279_v62, 0.0 }
 0x23d   : > { %1549 = vmatpush.msrb.mxu2 %v1402_v14  ;;  %1568 = vmatpush.msrb.mxu3 %v1419_v15  ;;  %v1258_v5 = vld [vmem:[#allocation2 + $0x28] sm:$0xff]  ;;  %v1361_v6 = vld [vmem:[%s3451_s2 + $0x218] sm:$0xff]  ;;  %v1378_v7 = vld [vmem:[%s3451_s2 + $0x2a0] sm:$0xff] }
 0x23e   : > { %1509 = vmatpush.msrb.mxu0 %v1370_v16  ;;  %1528 = vmatpush.msrb.mxu1 %v1387_v17  ;;  %v1392_v10 = vld [vmem:[%s3451_s2 + $0x310] sm:$0xff]  ;;  %v1256_v12 = vld [vmem:[#allocation2 + $0x8] sm:$0xff]  ;;  %v1259_v13 = vld [vmem:[#allocation2 + $0x38] sm:$0xff]  ;;  %v1284_v15 = vadd.f32 %v1268_v2, %v1258_v5  ;;  %v1267_v16 = vperm.slane %v3257_v26, 5 }
 0x23f   : > { %1550 = vmatpush.msrb.mxu2 %v1401_v18  ;;  %1569 = vmatpush.msrb.mxu3 %v1418_v19  ;;  %v1409_v14 = vld [vmem:[%s3451_s2 + $0x398] sm:$0xff]  ;;  %v1360_v17 = vld [vmem:[%s3451_s2 + $0x210] sm:$0xff]  ;;  %v1257_v19 = vld [vmem:[#allocation2 + $0x20] sm:$0xff] }
 0x240   : > { %1510 = vmatpush.msrb.mxu0 %v1369_v20  ;;  %1529 = vmatpush.msrb.mxu1 %v1386_v21  ;;  %v1377_v18 = vld [vmem:[%s3451_s2 + $0x298] sm:$0xff]  ;;  %v1391_v20 = vld [vmem:[%s3451_s2 + $0x308] sm:$0xff]  ;;  %v1408_v21 = vld [vmem:[%s3451_s2 + $0x390] sm:$0xff] }
 0x241   : > { %1551 = vmatpush.msrb.mxu2 %v1400_v22  ;;  %1570 = vmatpush.msrb.mxu3 %v1417_v23  ;;  %v1282_v22 = vadd.f32 %v1266_v8, %v1256_v12  ;;  %v1285_v23 = vadd.f32 %v1269_v9, %v1259_v13  ;;  %v1390_v26 = vld [vmem:[%s3451_s2 + $0x300] sm:$0xff] }
 0x242   : > { %1511 = vmatpush.msrb.mxu0 %v1368_v24  ;;  %1530 = vmatpush.msrb.mxu1 %v1385_v25  ;;  %v1359_v24 = vld [vmem:[%s3451_s2 + $0x208] sm:$0xff]  ;;  %v1376_v25 = vld [vmem:[%s3451_s2 + $0x290] sm:$0xff] }
 0x243   : > { %1552 = vmatpush.msrb.mxu2 %v1399_v27  ;;  %1571 = vmatpush.msrb.mxu3 %v1416_v28  ;;  %v1407_v27 = vld [vmem:[%s3451_s2 + $0x388] sm:$0xff]  ;;  %v1292_v28 = vmax.f32 %v1284_v15, 0.0  ;;  %v1290_v33 = vmax.f32 %v1282_v22, 0.0 }
 0x244   : > { %1512 = vmatpush.msrb.mxu0 %v1367_v29  ;;  %1531 = vmatpush.msrb.mxu1 %v1384_v30  ;;  %v1283_v29 = vadd.f32 %v1267_v16, %v1257_v19  ;;  %v1358_v30 = vld [vmem:[%s3451_s2 + $0x200] sm:$0xff] }
 0x245   : > { %1553 = vmatpush.msrb.mxu2 %v1398_v31  ;;  %1572 = vmatpush.msrb.mxu3 %v1415_v32  ;;  %v1375_v31 = vld [vmem:[%s3451_s2 + $0x288] sm:$0xff]  ;;  %v1406_v32 = vld [vmem:[%s3451_s2 + $0x380] sm:$0xff] }
 0x246   : > { %1513 = vmatpush.msrb.mxu0 %v1366_v34  ;;  %1532 = vmatpush.msrb.mxu1 %v1383_v35  ;;  %v1293_v34 = vmax.f32 %v1285_v23, 0.0  ;;  %v1374_v35 = vld [vmem:[%s3451_s2 + $0x280] sm:$0xff]  ;;  %v1291_v36 = vmax.f32 %v1283_v29, 0.0 }
 0x247   : > { %1554 = vmatpush.msrb.mxu2 %v1397_v37  ;;  %1573 = vmatpush.msrb.mxu3 %v1414_v38  ;;  %v2270_v37 = vld [vmem:[#allocation3] ss:$0 sm:$0xff] }
 0x248   : > { %1514 = vmatpush.msrb.mxu0 %v1365_v40  ;;  %1533 = vmatpush.msrb.mxu1 %v1382_v41 }
 0x249   : > { %1555 = vmatpush.msrb.mxu2 %v1396_v44  ;;  %1574 = vmatpush.msrb.mxu3 %v1413_v45 }
 0x24a   : > { %1515 = vmatpush.msrb.mxu0 %v1364_v48  ;;  %1534 = vmatpush.msrb.mxu1 %v1381_v49 }
 0x24b   : > { %1556 = vmatpush.msrb.mxu2 %v1395_v51  ;;  %1575 = vmatpush.msrb.mxu3 %v1412_v52 }
 0x24c   : > { %1516 = vmatpush.msrb.mxu0 %v1363_v55  ;;  %1535 = vmatpush.msrb.mxu1 %v1380_v56 }
 0x24d   : > { %1557 = vmatpush.msrb.mxu2 %v1394_v58  ;;  %1576 = vmatpush.msrb.mxu3 %v1411_v59 }
 0x24e   : > { %1482 = vmatmul.f32.vlgmr.msra.gmra.mxu2 %v1288_v60  ;;  %1517 = vmatpush.msrb.mxu0 %v1362_v61 }
 0x24f   : > { %1536 = vmatpush.msrb.mxu1 %v1379_v63  ;;  %1558 = vmatpush.msrb.mxu2 %v1393_v0 }
 0x250   : > { %1577 = vmatpush.msrb.mxu3 %v1410_v3  ;;  %1442 = vmatmul.f32.vlgmr.msra.gmra.mxu0 %v1286_v1 }
 0x251   : > { %1502 = vmatmul.f32.vlgmr.msra.gmra.mxu3 %v1289_v4  ;;  %1518 = vmatpush.msrb.mxu0 %v1361_v6 }
 0x252   : > { %1537 = vmatpush.msrb.mxu1 %v1378_v7  ;;  %1559 = vmatpush.msrb.mxu2 %v1392_v10 }
 0x253   : > { %1578 = vmatpush.msrb.mxu3 %v1409_v14  ;;  %1462 = vmatmul.f32.vlgmr.msra.gmra.mxu1 %v1287_v11 }
 0x254   : > { %1519 = vmatpush.msrb.mxu0 %v1360_v17  ;;  %1538 = vmatpush.msrb.mxu1 %v1377_v18 }
 0x255   : > { %1560 = vmatpush.msrb.mxu2 %v1391_v20  ;;  %1579 = vmatpush.msrb.mxu3 %v1408_v21 }
 0x256   : > { %1520 = vmatpush.msrb.mxu0 %v1359_v24  ;;  %1539 = vmatpush.msrb.mxu1 %v1376_v25 }
 0x257   : > { %1561 = vmatpush.msrb.mxu2 %v1390_v26  ;;  %1580 = vmatpush.msrb.mxu3 %v1407_v27 }
 0x258   : > { %1562 = vmatmul.f32.vlgmr.msrb.gmra.mxu2 %v1292_v28  ;;  %1521 = vmatpush.msrb.mxu0 %v1358_v30 }
 0x259   : > { %1540 = vmatpush.msrb.mxu1 %v1375_v31  ;;  %1581 = vmatpush.msrb.mxu3 %v1406_v32 }
 0x25a   : > { %1522 = vmatmul.f32.vlgmr.msrb.gmra.mxu0 %v1290_v33  ;;  %1582 = vmatmul.f32.vlgmr.msrb.gmra.mxu3 %v1293_v34 }
 0x25b   : > { %1541 = vmatpush.msrb.mxu1 %v1374_v35 }
 0x25c   : > { %1542 = vmatmul.f32.vlgmr.msrb.gmra.mxu1 %v1291_v36 }
 0x2cd   : > { %v1443_v38 = vpop.f32.mrf.mxu0 }
 0x2ce   : > { %v1444_v39 = vadd.f32 %v2270_v37, %v1443_v38 }
 0x2d0   : > { %v1463_v40 = vpop.f32.mrf.mxu1 }
 0x2d1   : > { %v1464_v41 = vadd.f32 %v1463_v40, %v1444_v39  ;;  %v1483_v42 = vpop.f32.mrf.mxu2 }
 0x2d3   : > { %v1484_v43 = vadd.f32 %v1483_v42, %v1464_v41 }
 0x2d4   : > { %v1503_v44 = vpop.f32.mrf.mxu3 }
 0x2d5   : > { %v1504_v45 = vadd.f32 %v1503_v44, %v1484_v43 }
 0x2d7   : > { %v1523_v46 = vpop.f32.mrf.mxu0 }
 0x2d8   : > { %v1524_v47 = vadd.f32 %v1523_v46, %v1504_v45 }
 0x2d9   : > { %v1543_v48 = vpop.f32.mrf.mxu1 }
 0x2da   : > { %v1544_v49 = vadd.f32 %v1543_v48, %v1524_v47 }
 0x2db   : > { %v1563_v50 = vpop.f32.mrf.mxu2 }
 0x2dc   : > { %v1564_v51 = vadd.f32 %v1563_v50, %v1544_v49 }
 0x2dd   : > { %v1583_v52 = vpop.f32.mrf.mxu3 }
 0x2de   : > { %v1584_v53 = vadd.f32 %v1583_v52, %v1564_v51 }
 0x2e0   : > { %v1586_v54 = vsub.f32 0.0, %v1584_v53 }
 0x2e2   : > { %v1587_v55 = vmul.f32 1.442695, %v1586_v54 }
 0x2e4   : > { %2271 = vpow2.f32 %v1587_v55 }
 0x2ea   : > { %v2272_v56 = vpop.eup %2271 }
 0x2eb   : > { %v1589_v57 = vadd.f32 1.0, %v2272_v56 }
 0x2ed   : > { %2273 = vrcp.f32 %v1589_v57  ;;  %v1601_v61 = vand.u32 2147483648, %v1589_v57  ;;  %v1599_v63 = vand.u32 2147483647, %v1589_v57  ;;  %vm1595_vm3 = vweird.f32 %v1589_v57 }
 0x2ef   : > { %v1602_v1 = vor.u32 1.1754944e-38, %v1601_v61  ;;  %vm1600_vm6 = vcmp.eq.f32.partialorder %v1599_v63, 8.507059e+37 }
 0x2f3   : > { %v2274_v58 = vpop.eup %2273 }
 0x2f4   : > { %v1591_v59 = vmul.f32 %v2274_v58, %v1589_v57  ;;  %vm1596_vm2 = vweird.f32 %v2274_v58 }
 0x2f5   : > { %vm1597_vm4 = vmor %vm1595_vm3, %vm1596_vm2 }
 0x2f6   : > { %v1592_v60 = vsub.f32 1.0, %v1591_v59 }
 0x2f8   : > { %v1593_v62 = vmul.f32 %v2274_v58, %v1592_v60 }
 0x2fa   : > { %v1594_v0 = vadd.f32 %v2274_v58, %v1593_v62 }
 0x2fc   : > { %v1598_v2 = vsel %vm1597_vm4, %v2274_v58, %v1594_v0 }
 0x2fd   : > { %v1603_v3 = vsel %vm1600_vm6, %v1602_v1, %v1598_v2 }
 0x2fe   : > { %1606 = vst.msk [vmem:[%s3452_s14] sm:$0xff] %vm1605_vm5, %v1603_v3 }
 0x2ff PF: > { %s34_s10 = sadd.s32 1, %s2619_s10   ;;  %s3453_s1 = smov %s2800_s19 }
 0x300   : > { %p31_p3 = scmp.ge.s32.totalorder %s34_s10, 10   ;;  %s3454_s19 = smov %s2603_s20 }
 0x301   : > { %s3455_s20 = smov %s2607_s21  ;;  %s3456_s21 = smov %s3453_s1 }
 0x302   : > { %s3457_s22 = smov %s2615_s23  ;;  %s3458_s23 = smov %s3460_s3 }
 0x303   :  { %33 = sbr.rel (!%p31_p3) target bundleno = 20 (0x14), region = 162 }
 0x308   :  { %1626 = vsyncpa [#allocation5], 1 }
 0x309   :  { %1628 = vsyncpa [#allocation5 + $0x1], 1 }
 0x30a   :  { %1629 = vsyncpa [#allocation7], 1 }
 0x30b   :  { %1631 = vsyncpa [#allocation7 + $0x1], 1 }
 0x30c   :  { %1632 = vsyncpa [#allocation10], 1 }
 0x30d   :  { %1633 = vsyncpa [#allocation13], 1 }
 0x30e   :  { %1634 = vsyncpa [#allocation16], 1 }
 0x30f   :  { %1636 = vsyncpa [#allocation16 + $0x1], 1 }

</bundles_post_ra>
